<compile_context>
chip_gen: v6e
topology: v6e:2x2x1
jax: 0.10.0
libtpu: 0.0.40
codegen_flags: <defaults>
</compile_context>

<pallas_src>
import math
import functools
import numpy as np

import jax
import jax.numpy as jnp
from jax import lax
from jax.experimental import pallas as pl
from jax.experimental.pallas import tpu as pltpu

# contract dim-1 of activations with dim-1 of weights stored as [Dout, Din] (no transpose)
_DN = (((1,), (1,)), ((), ()))
_EPS = 1e-5
_NEG = -1e30          # finite "minus infinity" for the causal mask
_VMEM_LIMIT = 48 * 1024 * 1024   # safe on v5e/v6e (128 MiB) and v7x (64 MiB) TCs

_CP_ATTN = pltpu.CompilerParams(
    dimension_semantics=("parallel", "parallel", "arbitrary"),
    vmem_limit_bytes=_VMEM_LIMIT)
_CP_2D = pltpu.CompilerParams(
    dimension_semantics=("parallel", "parallel"),
    vmem_limit_bytes=_VMEM_LIMIT)


# ----------------------- kernel helpers -----------------------

def _layernorm(z, g, b, eps):
    """f32 LayerNorm over the last dim (v5e has no bf16 VPU/EUP path)."""
    mean = jnp.mean(z, axis=-1, keepdims=True)
    zc = z - mean
    var = jnp.mean(zc * zc, axis=-1, keepdims=True)
    return zc * lax.rsqrt(var + eps) * g + b


def _attend_one_head(xq_b16, kv_src_b16, wq_ref, bq_ref, wk_ref, bk_ref,
                     wv_ref, bv_ref, wo_ref, *, causal, q_start):
    """One head's attention for one q-block; returns its out-proj contribution [TQ, E]."""
    Dh = wq_ref.shape[0]
    scale = 1.0 / math.sqrt(Dh)

    q = lax.dot_general(xq_b16, wq_ref[...], _DN,
                        preferred_element_type=jnp.float32) + bq_ref[...]        # [TQ, Dh]
    k = lax.dot_general(kv_src_b16, wk_ref[...], _DN,
                        preferred_element_type=jnp.float32) + bk_ref[...]        # [S, Dh]
    v = lax.dot_general(kv_src_b16, wv_ref[...], _DN,
                        preferred_element_type=jnp.float32) + bv_ref[...]        # [S, Dh]

    s = lax.dot_general(q.astype(jnp.bfloat16), k.astype(jnp.bfloat16),
                        (((1,), (1,)), ((), ())),
                        preferred_element_type=jnp.float32) * scale              # [TQ, S]
    if causal:
        TQ, S = s.shape
        row = q_start + lax.broadcasted_iota(jnp.int32, (TQ, S), 0)
        col = lax.broadcasted_iota(jnp.int32, (TQ, S), 1)
        s = s + jnp.where(col <= row, 0.0, _NEG)                                 # additive finite mask

    m = jnp.max(s, axis=-1, keepdims=True)
    p = jnp.exp(s - m)
    l = jnp.sum(p, axis=-1, keepdims=True)
    p = p * pl.reciprocal(l, approx=True)                                        # EUP path

    o_h = lax.dot_general(p.astype(jnp.bfloat16), v.astype(jnp.bfloat16),
                          (((1,), (0,)), ((), ())),
                          preferred_element_type=jnp.float32)                    # [TQ, Dh]
    # head contribution to the output projection: [TQ, Dh] x Wo[:, h*Dh:(h+1)*Dh]
    return lax.dot_general(o_h.astype(jnp.bfloat16), wo_ref[...], _DN,
                           preferred_element_type=jnp.float32)                   # [TQ, E]


# ----------------------- Pallas kernels -----------------------

def _self_attn_kernel(x_ref, wq_ref, bq_ref, wk_ref, bk_ref, wv_ref, bv_ref,
                      wo_ref, bo_ref, g_ref, be_ref, o_ref, acc_ref, *, TQ, eps):
    """LN1(x + SelfAttn(x)) for one (batch, q-block); grid axis 2 reduces over heads."""
    h = pl.program_id(2)
    qb = pl.program_id(1)

    @pl.when(h == 0)
    def _():
        acc_ref[...] = jnp.zeros_like(acc_ref)

    q_start = pl.multiple_of(qb * TQ, TQ)
    xq = x_ref[pl.ds(q_start, TQ), :]                      # [TQ, E] f32 (residual / Q source)
    x_b16 = x_ref[...].astype(jnp.bfloat16)                # [T, E]   (K/V source)
    xq_b16 = xq.astype(jnp.bfloat16)

    acc_ref[...] += _attend_one_head(xq_b16, x_b16, wq_ref, bq_ref, wk_ref, bk_ref,
                                     wv_ref, bv_ref, wo_ref, causal=True, q_start=q_start)

    @pl.when(h == pl.num_programs(2) - 1)
    def _():
        z = xq + acc_ref[...] + bo_ref[...]
        o_ref[...] = _layernorm(z, g_ref[...], be_ref[...], eps).astype(o_ref.dtype)


def _cross_ffn_kernel(x_ref, mem_ref, wq_ref, bq_ref, wk_ref, bk_ref, wv_ref, bv_ref,
                      wo_ref, bo_ref, g2_ref, be2_ref, w1_ref, b1_ref, w2_ref, b2_ref,
                      g3_ref, be3_ref, o_ref, acc_ref, *, eps):
    """LN3(z2 + FFN(z2)) with z2 = LN2(x + CrossAttn(x, mem)); fused per (batch, q-block)."""
    h = pl.program_id(2)

    @pl.when(h == 0)
    def _():
        acc_ref[...] = jnp.zeros_like(acc_ref)

    xq = x_ref[...]                                        # [TQ, E] f32
    xq_b16 = xq.astype(jnp.bfloat16)
    mem_b16 = mem_ref[...].astype(jnp.bfloat16)            # [S, E]

    acc_ref[...] += _attend_one_head(xq_b16, mem_b16, wq_ref, bq_ref, wk_ref, bk_ref,
                                     wv_ref, bv_ref, wo_ref, causal=False, q_start=0)

    @pl.when(h == pl.num_programs(2) - 1)
    def _():
        z2 = _layernorm(xq + acc_ref[...] + bo_ref[...], g2_ref[...], be2_ref[...], eps)
        hid = lax.dot_general(z2.astype(jnp.bfloat16), w1_ref[...], _DN,
                              preferred_element_type=jnp.float32) + b1_ref[...]
        hid = jnp.maximum(hid, 0.0)
        y = lax.dot_general(hid.astype(jnp.bfloat16), w2_ref[...], _DN,
                            preferred_element_type=jnp.float32) + b2_ref[...]
        o_ref[...] = _layernorm(z2 + y, g3_ref[...], be3_ref[...], eps).astype(o_ref.dtype)


def _fc_kernel(x_ref, w_ref, b_ref, o_ref):
    """Vocab projection tile: [TN, E] x [TV, E]^T -> lane-dense [TN, TV]."""
    y = lax.dot_general(x_ref[...].astype(jnp.bfloat16), w_ref[...], _DN,
                        preferred_element_type=jnp.float32) + b_ref[...]
    o_ref[...] = y.astype(o_ref.dtype)


# ----------------------- kernel wrappers -----------------------

def _q_tile(T):
    return 128 if T % 128 == 0 else T


def self_attn_block(x_bte, ap, ln_g, ln_b, *, H):
    B, T, E = x_bte.shape
    Dh = E // H
    TQ = _q_tile(T)
    QB = T // TQ
    head_spec = pl.BlockSpec((None, Dh, E), lambda b, q, h: (h, 0, 0))
    hbias_spec = pl.BlockSpec((None, 1, Dh), lambda b, q, h: (h, 0, 0))
    vec_spec = pl.BlockSpec((1, E), lambda b, q, h: (0, 0))
    return pl.pallas_call(
        functools.partial(_self_attn_kernel, TQ=TQ, eps=_EPS),
        grid=(B, QB, H),
        in_specs=[
            pl.BlockSpec((None, T, E), lambda b, q, h: (b, 0, 0)),     # x (full seq of batch b)
            head_spec, hbias_spec,                                     # wq, bq
            head_spec, hbias_spec,                                     # wk, bk
            head_spec, hbias_spec,                                     # wv, bv
            pl.BlockSpec((None, E, Dh), lambda b, q, h: (h, 0, 0)),    # wo (per-head columns)
            vec_spec, vec_spec, vec_spec,                              # bo, ln1_g, ln1_b
        ],
        out_specs=pl.BlockSpec((None, TQ, E), lambda b, q, h: (b, q, 0)),
        out_shape=jax.ShapeDtypeStruct((B, T, E), jnp.float32),
        scratch_shapes=[pltpu.VMEM((TQ, E), jnp.float32)],
        compiler_params=_CP_ATTN,
    )(x_bte, ap["wq"], ap["bq"], ap["wk"], ap["bk"], ap["wv"], ap["bv"],
      ap["wo"], ap["bo"], ln_g, ln_b)


def cross_ffn_block(x_bte, mem_bse, ap, ln2_g, ln2_b, ffp, ln3_g, ln3_b, *, H):
    B, T, E = x_bte.shape
    S = mem_bse.shape[1]
    FF = ffp["w1"].shape[0]
    Dh = E // H
    TQ = _q_tile(T)
    QB = T // TQ
    head_spec = pl.BlockSpec((None, Dh, E), lambda b, q, h: (h, 0, 0))
    hbias_spec = pl.BlockSpec((None, 1, Dh), lambda b, q, h: (h, 0, 0))
    vec_spec = pl.BlockSpec((1, E), lambda b, q, h: (0, 0))
    return pl.pallas_call(
        functools.partial(_cross_ffn_kernel, eps=_EPS),
        grid=(B, QB, H),
        in_specs=[
            pl.BlockSpec((None, TQ, E), lambda b, q, h: (b, q, 0)),    # x q-block
            pl.BlockSpec((None, S, E), lambda b, q, h: (b, 0, 0)),     # memory (full S of batch b)
            head_spec, hbias_spec,                                     # wq, bq
            head_spec, hbias_spec,                                     # wk, bk
            head_spec, hbias_spec,                                     # wv, bv
            pl.BlockSpec((None, E, Dh), lambda b, q, h: (h, 0, 0)),    # wo
            vec_spec, vec_spec, vec_spec,                              # bo, ln2_g, ln2_b
            pl.BlockSpec((FF, E), lambda b, q, h: (0, 0)),             # w1
            pl.BlockSpec((1, FF), lambda b, q, h: (0, 0)),             # b1
            pl.BlockSpec((E, FF), lambda b, q, h: (0, 0)),             # w2
            vec_spec,                                                  # b2
            vec_spec, vec_spec,                                        # ln3_g, ln3_b
        ],
        out_specs=pl.BlockSpec((None, TQ, E), lambda b, q, h: (b, q, 0)),
        out_shape=jax.ShapeDtypeStruct((B, T, E), jnp.float32),
        scratch_shapes=[pltpu.VMEM((TQ, E), jnp.float32)],
        compiler_params=_CP_ATTN,
    )(x_bte, mem_bse, ap["wq"], ap["bq"], ap["wk"], ap["bk"], ap["wv"], ap["bv"],
      ap["wo"], ap["bo"], ln2_g, ln2_b,
      ffp["w1"], ffp["b1"], ffp["w2"], ffp["b2"], ln3_g, ln3_b)


def vocab_projection(x2d, w_pad, b_pad):
    N, E = x2d.shape
    Vp = w_pad.shape[0]
    TN = 256 if N % 256 == 0 else N
    TV = 512 if Vp % 512 == 0 else (256 if Vp % 256 == 0 else 128)
    return pl.pallas_call(
        _fc_kernel,
        grid=(N // TN, Vp // TV),
        in_specs=[
            pl.BlockSpec((TN, E), lambda n, v: (n, 0)),
            pl.BlockSpec((TV, E), lambda n, v: (v, 0)),
            pl.BlockSpec((1, TV), lambda n, v: (0, v)),
        ],
        out_specs=pl.BlockSpec((TN, TV), lambda n, v: (n, v)),
        out_shape=jax.ShapeDtypeStruct((N, Vp), jnp.float32),
        compiler_params=_CP_2D,
    )(x2d, w_pad, b_pad)


# ----------------------- model glue -----------------------

def create_positional_embedding(max_len, embed_dim):
    pe = np.zeros([max_len, 1, embed_dim + 1], dtype=np.float64)
    ite = math.floor((embed_dim + 1) / 2)
    for i in range(ite):
        pe[:, 0, 2 * i] = np.sin(np.arange(max_len) / 10000.0 ** (2 * i / embed_dim))
        pe[:, 0, 2 * i + 1] = np.cos(np.arange(max_len) / 10000.0 ** (2 * i / embed_dim))
    return jnp.asarray(pe[:, :, :embed_dim], dtype=jnp.float32)


def transformer_decoder_forward(params, dec_in, enc_out, *, num_heads, trg_vocab_size):
    """dec_in: [T, B] int32;  enc_out: [S, B, E]  ->  [T, B, V]"""
    T, B = dec_in.shape
    S, _, E = enc_out.shape

    x = jnp.take(params["embedding"], dec_in, axis=0)          # [T, B, E]
    x = x + params["pos_emb"][:T]                              # broadcast [T, 1, E]
    # nn.Dropout: eval mode -> identity.
    # TODO(synk): training-mode dropout (random masking) not reproduced.
    x = x.astype(jnp.float32).transpose(1, 0, 2)               # [B, T, E] (batch-leading inside kernels)
    mem = enc_out.astype(jnp.float32).transpose(1, 0, 2)       # [B, S, E]

    # TODO(synk): stack per-layer weights as [L, ...] and fuse all layers into one
    # pallas_call with a layer grid axis + resident-x VMEM accumulator.
    for lp in params["layers"]:
        x = self_attn_block(x, lp["self_attn"], lp["ln1_g"], lp["ln1_b"], H=num_heads)
        x = cross_ffn_block(x, mem, lp["cross_attn"], lp["ln2_g"], lp["ln2_b"],
                            lp["ffn"], lp["ln3_g"], lp["ln3_b"], H=num_heads)

    logits_pad = vocab_projection(x.reshape(B * T, E),
                                  params["fc_w_pad"], params["fc_b_pad"])       # [B*T, Vp]
    logits = logits_pad[:, :trg_vocab_size].reshape(B, T, trg_vocab_size)
    return logits.transpose(1, 0, 2)                                            # [T, B, V]


def init_params(key, vocab, E, num_heads, num_layers, FF, max_len_trg):
    H = num_heads
    assert E % H == 0
    Dh = E // H
    keys = iter(jax.random.split(key, 4 + num_layers * 16))

    def nrm(shape, scale=0.05):
        return (scale * jax.random.normal(next(keys), shape)).astype(jnp.float32)

    Vp = ((vocab + 127) // 128) * 128          # lane-dense (multiple of 128) logits width
    fc_w = nrm((vocab, E))
    fc_b = nrm((vocab,))

    params = {
        "embedding": nrm((vocab, E), 0.1),     # stands in for pretrained_emb
        "pos_emb": create_positional_embedding(max_len_trg, E),
        "fc_w_pad": jnp.zeros((Vp, E), jnp.float32).at[:vocab].set(fc_w).astype(jnp.bfloat16),
        "fc_b_pad": jnp.zeros((1, Vp), jnp.float32).at[0, :vocab].set(fc_b),
        "layers": [],
    }

    def attn_params():
        # nn.MultiheadAttention in_proj layout [Wq; Wk; Wv], each [E, E] = [Dout, Din].
        in_w = nrm((3 * E, E))
        in_b = nrm((3 * E,))
        wq, wk, wv = in_w[:E], in_w[E:2 * E], in_w[2 * E:]
        bq, bk, bv = in_b[:E], in_b[E:2 * E], in_b[2 * E:]
        wo = nrm((E, E))
        bo = nrm((E,))
        return {
            # per-head stacks so heads become a grid dim (no in-kernel transposes)
            "wq": wq.reshape(H, Dh, E).astype(jnp.bfloat16),
            "bq": bq.reshape(H, 1, Dh),
            "wk": wk.reshape(H, Dh, E).astype(jnp.bfloat16),
            "bk": bk.reshape(H, 1, Dh),
            "wv": wv.reshape(H, Dh, E).astype(jnp.bfloat16),
            "bv": bv.reshape(H, 1, Dh),
            "wo": wo.reshape(E, H, Dh).transpose(1, 0, 2).astype(jnp.bfloat16),  # [H, E, Dh]
            "bo": bo.reshape(1, E),
        }

    for _ in range(num_layers):
        lp = {
            "self_attn": attn_params(),
            "cross_attn": attn_params(),
            "ffn": {
                "w1": nrm((FF, E)).astype(jnp.bfloat16), "b1": nrm((1, FF)),
                "w2": nrm((E, FF)).astype(jnp.bfloat16), "b2": nrm((1, E)),
            },
            "ln1_g": jnp.ones((1, E), jnp.float32), "ln1_b": jnp.zeros((1, E), jnp.float32),
            "ln2_g": jnp.ones((1, E), jnp.float32), "ln2_b": jnp.zeros((1, E), jnp.float32),
            "ln3_g": jnp.ones((1, E), jnp.float32), "ln3_b": jnp.zeros((1, E), jnp.float32),
        }
        params["layers"].append(lp)
    return params


if __name__ == "__main__":
    # Small deterministic configuration.
    T, B, E = 8, 2, 32          # target seq len, batch, embedding_dim (d_model)
    H, L, FF = 4, 2, 64         # num_heads, num_layers, dim_feedforward
    V = 50                      # trg_vocab_size
    MAX_LEN_TRG = 16
    S = 12                      # encoder memory length (max_len)

    key = jax.random.PRNGKey(0)
    k_par, k_tok, k_mem = jax.random.split(key, 3)

    params = init_params(k_par, V, E, H, L, FF, MAX_LEN_TRG)
    dec_in = jax.random.randint(k_tok, (T, B), 0, V, dtype=jnp.int32)       # [T, B]
    enc_out = jax.random.normal(k_mem, (S, B, E), dtype=jnp.float32)        # [S, B, E]

    fwd = jax.jit(functools.partial(transformer_decoder_forward,
                                    num_heads=H, trg_vocab_size=V))
    out = jax.block_until_ready(fwd(params, dec_in, enc_out))

    assert out.shape == (T, B, V), out.shape
    assert bool(jnp.all(jnp.isfinite(out)))
    print("KERNEL_OK")
</pallas_src>

<mosaic_0001>
module attributes {stable_mosaic.version = 11 : i64} {
  func.func @_fc_kernel(%arg0: i32, %arg1: i32, %arg2: memref<16x32xf32, #tpu.memory_space<vmem>>, %arg3: memref<128x32xbf16, #tpu.memory_space<vmem>>, %arg4: memref<1x128xf32, #tpu.memory_space<vmem>>, %arg5: memref<16x128xf32, #tpu.memory_space<vmem>>) attributes {dimension_semantics = [#tpu.dimension_semantics<parallel>, #tpu.dimension_semantics<parallel>], iteration_bounds = array<i64: 1, 1>, scalar_prefetch = 0 : i64, scratch_operands = 0 : i64, tpu.core_type = #tpu.core_type<tc>, window_params = [{transform_indices = @transform_0, window_bounds = array<i64: 16, 32>}, {transform_indices = @transform_1, window_bounds = array<i64: 128, 32>}, {transform_indices = @transform_2, window_bounds = array<i64: 1, 128>}, {transform_indices = @transform_3, window_bounds = array<i64: 16, 128>}]} {
    %c0 = arith.constant 0 : index
    %c0_0 = arith.constant 0 : index
    %0 = vector.load %arg2[%c0, %c0_0] : memref<16x32xf32, #tpu.memory_space<vmem>>, vector<16x32xf32>
    %1 = arith.truncf %0 : vector<16x32xf32> to vector<16x32xbf16>
    %c0_1 = arith.constant 0 : index
    %c0_2 = arith.constant 0 : index
    %2 = vector.load %arg3[%c0_1, %c0_2] : memref<128x32xbf16, #tpu.memory_space<vmem>>, vector<128x32xbf16>
    %cst = arith.constant dense<0.000000e+00> : vector<16x128xf32>
    %3 = tpu.matmul %1, %2, %cst {dimension_numbers = #tpu.dot_dimension_numbers<[1], [1], [0], [0], [0, 0, 1, 0], [], []>} : vector<16x32xbf16>, vector<128x32xbf16>, vector<16x128xf32> -> vector<16x128xf32>
    %c0_3 = arith.constant 0 : index
    %c0_4 = arith.constant 0 : index
    %4 = vector.load %arg4[%c0_3, %c0_4] : memref<1x128xf32, #tpu.memory_space<vmem>>, vector<1x128xf32>
    %5 = vector.broadcast %4 : vector<1x128xf32> to vector<16x128xf32>
    %6 = arith.addf %3, %5 : vector<16x128xf32>
    %c0_5 = arith.constant 0 : index
    %c0_6 = arith.constant 0 : index
    %7 = vector.load %arg5[%c0_5, %c0_6] : memref<16x128xf32, #tpu.memory_space<vmem>>, vector<16x128xf32>
    tpu.vector_store %arg5[%c0_5, %c0_6], %6 {strides = array<i32>} : memref<16x128xf32, #tpu.memory_space<vmem>>, vector<16x128xf32>,
    return
  }
  func.func @transform_0(%arg0: i32, %arg1: i32) -> (i32, i32) {
    %c0_i32 = arith.constant 0 : i32
    %c0_i32_0 = arith.constant 0 : i32
    return %arg0, %c0_i32 : i32, i32
  }
  func.func @transform_1(%arg0: i32, %arg1: i32) -> (i32, i32) {
    %c0_i32 = arith.constant 0 : i32
    %c0_i32_0 = arith.constant 0 : i32
    return %arg1, %c0_i32 : i32, i32
  }
  func.func @transform_2(%arg0: i32, %arg1: i32) -> (i32, i32) {
    %c0_i32 = arith.constant 0 : i32
    %c0_i32_0 = arith.constant 0 : i32
    return %c0_i32, %arg1 : i32, i32
  }
  func.func @transform_3(%arg0: i32, %arg1: i32) -> (i32, i32) {
    %c0_i32 = arith.constant 0 : i32
    return %arg0, %arg1 : i32, i32
  }
}

module attributes {stable_mosaic.version = 11 : i64} {
  func.func @_cross_ffn_kernel(%arg0: i32, %arg1: i32, %arg2: i32, %arg3: memref<1x8x32xf32, #tpu.memory_space<vmem>>, %arg4: memref<1x12x32xf32, #tpu.memory_space<vmem>>, %arg5: memref<1x8x32xbf16, #tpu.memory_space<vmem>>, %arg6: memref<1x1x8xf32, #tpu.memory_space<vmem>>, %arg7: memref<1x8x32xbf16, #tpu.memory_space<vmem>>, %arg8: memref<1x1x8xf32, #tpu.memory_space<vmem>>, %arg9: memref<1x8x32xbf16, #tpu.memory_space<vmem>>, %arg10: memref<1x1x8xf32, #tpu.memory_space<vmem>>, %arg11: memref<1x32x8xbf16, #tpu.memory_space<vmem>>, %arg12: memref<1x32xf32, #tpu.memory_space<vmem>>, %arg13: memref<1x32xf32, #tpu.memory_space<vmem>>, %arg14: memref<1x32xf32, #tpu.memory_space<vmem>>, %arg15: memref<64x32xbf16, #tpu.memory_space<vmem>>, %arg16: memref<1x64xf32, #tpu.memory_space<vmem>>, %arg17: memref<32x64xbf16, #tpu.memory_space<vmem>>, %arg18: memref<1x32xf32, #tpu.memory_space<vmem>>, %arg19: memref<1x32xf32, #tpu.memory_space<vmem>>, %arg20: memref<1x32xf32, #tpu.memory_space<vmem>>, %arg21: memref<1x8x32xf32, #tpu.memory_space<vmem>>, %arg22: memref<8x32xf32, #tpu.memory_space<vmem>>) attributes {dimension_semantics = [#tpu.dimension_semantics<parallel>, #tpu.dimension_semantics<parallel>, #tpu.dimension_semantics<arbitrary>], iteration_bounds = array<i64: 2, 1, 4>, scalar_prefetch = 0 : i64, scratch_operands = 1 : i64, tpu.core_type = #tpu.core_type<tc>, window_params = [{transform_indices = @transform_0, window_bounds = array<i64: 1, 8, 32>}, {transform_indices = @transform_1, window_bounds = array<i64: 1, 12, 32>}, {transform_indices = @transform_2, window_bounds = array<i64: 1, 8, 32>}, {transform_indices = @transform_3, window_bounds = array<i64: 1, 1, 8>}, {transform_indices = @transform_4, window_bounds = array<i64: 1, 8, 32>}, {transform_indices = @transform_5, window_bounds = array<i64: 1, 1, 8>}, {transform_indices = @transform_6, window_bounds = array<i64: 1, 8, 32>}, {transform_indices = @transform_7, window_bounds = array<i64: 1, 1, 8>}, {transform_indices = @transform_8, window_bounds = array<i64: 1, 32, 8>}, {pipeline_mode = #tpu.pipeline_mode<synchronous>, transform_indices = @transform_9, window_bounds = array<i64: 1, 32>}, {pipeline_mode = #tpu.pipeline_mode<synchronous>, transform_indices = @transform_10, window_bounds = array<i64: 1, 32>}, {pipeline_mode = #tpu.pipeline_mode<synchronous>, transform_indices = @transform_11, window_bounds = array<i64: 1, 32>}, {pipeline_mode = #tpu.pipeline_mode<synchronous>, transform_indices = @transform_12, window_bounds = array<i64: 64, 32>}, {pipeline_mode = #tpu.pipeline_mode<synchronous>, transform_indices = @transform_13, window_bounds = array<i64: 1, 64>}, {pipeline_mode = #tpu.pipeline_mode<synchronous>, transform_indices = @transform_14, window_bounds = array<i64: 32, 64>}, {pipeline_mode = #tpu.pipeline_mode<synchronous>, transform_indices = @transform_15, window_bounds = array<i64: 1, 32>}, {pipeline_mode = #tpu.pipeline_mode<synchronous>, transform_indices = @transform_16, window_bounds = array<i64: 1, 32>}, {pipeline_mode = #tpu.pipeline_mode<synchronous>, transform_indices = @transform_17, window_bounds = array<i64: 1, 32>}, {transform_indices = @transform_18, window_bounds = array<i64: 1, 8, 32>}]} {
    %c0_i32 = arith.constant 0 : i32
    %0 = arith.cmpi eq, %arg2, %c0_i32 : i32
    %1 = arith.extui %0 : i1 to i32
    %c0_i32_0 = arith.constant 0 : i32
    %2 = arith.cmpi ne, %1, %c0_i32_0 : i32
    scf.if %2 {
      %cst_40 = arith.constant 0.000000e+00 : f32
      %58 = vector.broadcast %cst_40 : f32 to vector<8x32xf32>
      %c0_41 = arith.constant 0 : index
      %c0_42 = arith.constant 0 : index
      %59 = vector.load %arg22[%c0_41, %c0_42] : memref<8x32xf32, #tpu.memory_space<vmem>>, vector<8x32xf32>
      tpu.vector_store %arg22[%c0_41, %c0_42], %58 {strides = array<i32>} : memref<8x32xf32, #tpu.memory_space<vmem>>, vector<8x32xf32>,
    } else {
    }
    %c0 = arith.constant 0 : index
    %c0_1 = arith.constant 0 : index
    %c0_2 = arith.constant 0 : index
    %3 = vector.load %arg3[%c0, %c0_1, %c0_2] : memref<1x8x32xf32, #tpu.memory_space<vmem>>, vector<1x8x32xf32>
    %4 = vector.shape_cast %3 : vector<1x8x32xf32> to vector<8x32xf32>
    %5 = arith.truncf %4 : vector<8x32xf32> to vector<8x32xbf16>
    %c0_3 = arith.constant 0 : index
    %c0_4 = arith.constant 0 : index
    %c0_5 = arith.constant 0 : index
    %6 = vector.load %arg4[%c0_3, %c0_4, %c0_5] : memref<1x12x32xf32, #tpu.memory_space<vmem>>, vector<1x12x32xf32>
    %7 = vector.shape_cast %6 : vector<1x12x32xf32> to vector<12x32xf32>
    %8 = arith.truncf %7 : vector<12x32xf32> to vector<12x32xbf16>
    %c0_6 = arith.constant 0 : index
    %c0_7 = arith.constant 0 : index
    %9 = vector.load %arg22[%c0_6, %c0_7] : memref<8x32xf32, #tpu.memory_space<vmem>>, vector<8x32xf32>
    %c0_8 = arith.constant 0 : index
    %c0_9 = arith.constant 0 : index
    %c0_10 = arith.constant 0 : index
    %10 = vector.load %arg5[%c0_8, %c0_9, %c0_10] : memref<1x8x32xbf16, #tpu.memory_space<vmem>>, vector<1x8x32xbf16>
    %11 = vector.shape_cast %10 : vector<1x8x32xbf16> to vector<8x32xbf16>
    %cst = arith.constant dense<0.000000e+00> : vector<8x8xf32>
    %12 = tpu.matmul %5, %11, %cst {dimension_numbers = #tpu.dot_dimension_numbers<[1], [1], [0], [0], [0, 0, 1, 0], [], []>} : vector<8x32xbf16>, vector<8x32xbf16>, vector<8x8xf32> -> vector<8x8xf32>
    %c0_11 = arith.constant 0 : index
    %c0_12 = arith.constant 0 : index
    %c0_13 = arith.constant 0 : index
    %13 = vector.load %arg6[%c0_11, %c0_12, %c0_13] : memref<1x1x8xf32, #tpu.memory_space<vmem>>, vector<1x1x8xf32>
    %14 = vector.shape_cast %13 : vector<1x1x8xf32> to vector<1x8xf32>
    %15 = vector.broadcast %14 : vector<1x8xf32> to vector<8x8xf32>
    %16 = arith.addf %12, %15 : vector<8x8xf32>
    %c0_14 = arith.constant 0 : index
    %c0_15 = arith.constant 0 : index
    %c0_16 = arith.constant 0 : index
    %17 = vector.load %arg7[%c0_14, %c0_15, %c0_16] : memref<1x8x32xbf16, #tpu.memory_space<vmem>>, vector<1x8x32xbf16>
    %18 = vector.shape_cast %17 : vector<1x8x32xbf16> to vector<8x32xbf16>
    %cst_17 = arith.constant dense<0.000000e+00> : vector<12x8xf32>
    %19 = tpu.matmul %8, %18, %cst_17 {dimension_numbers = #tpu.dot_dimension_numbers<[1], [1], [0], [0], [0, 0, 1, 0], [], []>} : vector<12x32xbf16>, vector<8x32xbf16>, vector<12x8xf32> -> vector<12x8xf32>
    %c0_18 = arith.constant 0 : index
    %c0_19 = arith.constant 0 : index
    %c0_20 = arith.constant 0 : index
    %20 = vector.load %arg8[%c0_18, %c0_19, %c0_20] : memref<1x1x8xf32, #tpu.memory_space<vmem>>, vector<1x1x8xf32>
    %21 = vector.shape_cast %20 : vector<1x1x8xf32> to vector<1x8xf32>
    %22 = vector.broadcast %21 : vector<1x8xf32> to vector<12x8xf32>
    %23 = arith.addf %19, %22 : vector<12x8xf32>
    %c0_21 = arith.constant 0 : index
    %c0_22 = arith.constant 0 : index
    %c0_23 = arith.constant 0 : index
    %24 = vector.load %arg9[%c0_21, %c0_22, %c0_23] : memref<1x8x32xbf16, #tpu.memory_space<vmem>>, vector<1x8x32xbf16>
    %25 = vector.shape_cast %24 : vector<1x8x32xbf16> to vector<8x32xbf16>
    %cst_24 = arith.constant dense<0.000000e+00> : vector<12x8xf32>
    %26 = tpu.matmul %8, %25, %cst_24 {dimension_numbers = #tpu.dot_dimension_numbers<[1], [1], [0], [0], [0, 0, 1, 0], [], []>} : vector<12x32xbf16>, vector<8x32xbf16>, vector<12x8xf32> -> vector<12x8xf32>
    %c0_25 = arith.constant 0 : index
    %c0_26 = arith.constant 0 : index
    %c0_27 = arith.constant 0 : index
    %27 = vector.load %arg10[%c0_25, %c0_26, %c0_27] : memref<1x1x8xf32, #tpu.memory_space<vmem>>, vector<1x1x8xf32>
    %28 = vector.shape_cast %27 : vector<1x1x8xf32> to vector<1x8xf32>
    %29 = vector.broadcast %28 : vector<1x8xf32> to vector<12x8xf32>
    %30 = arith.addf %26, %29 : vector<12x8xf32>
    %31 = arith.truncf %16 : vector<8x8xf32> to vector<8x8xbf16>
    %32 = arith.truncf %23 : vector<12x8xf32> to vector<12x8xbf16>
    %cst_28 = arith.constant dense<0.000000e+00> : vector<8x12xf32>
    %33 = tpu.matmul %31, %32, %cst_28 {dimension_numbers = #tpu.dot_dimension_numbers<[1], [1], [0], [0], [0, 0, 1, 0], [], []>} : vector<8x8xbf16>, vector<12x8xbf16>, vector<8x12xf32> -> vector<8x12xf32>
    %cst_29 = arith.constant 0.353553385 : f32
    %34 = vector.broadcast %cst_29 : f32 to vector<8x12xf32>
    %35 = arith.mulf %33, %34 : vector<8x12xf32>
    %cst_30 = arith.constant dense<0xFF800000> : vector<8xf32>
    %36 = vector.multi_reduction <maximumf>, %35, %cst_30 [1] : vector<8x12xf32> to vector<8xf32>
    %37 = vector.shape_cast %36 : vector<8xf32> to vector<8x1xf32>
    %38 = vector.broadcast %37 : vector<8x1xf32> to vector<8x12xf32>
    %39 = arith.subf %35, %38 : vector<8x12xf32>
    %40 = math.exp %39 : vector<8x12xf32>
    %cst_31 = arith.constant dense<0.000000e+00> : vector<8xf32>
    %41 = vector.multi_reduction <add>, %40, %cst_31 [1] : vector<8x12xf32> to vector<8xf32>
    %42 = vector.shape_cast %41 : vector<8xf32> to vector<8x1xf32>
    %43 = tpu.reciprocal %42 {approx = true} : vector<8x1xf32> -> vector<8x1xf32>
    %44 = vector.broadcast %43 : vector<8x1xf32> to vector<8x12xf32>
    %45 = arith.mulf %40, %44 : vector<8x12xf32>
    %46 = arith.truncf %45 : vector<8x12xf32> to vector<8x12xbf16>
    %47 = arith.truncf %30 : vector<12x8xf32> to vector<12x8xbf16>
    %cst_32 = arith.constant dense<0.000000e+00> : vector<8x8xf32>
    %48 = tpu.matmul %46, %47, %cst_32 {dimension_numbers = #tpu.dot_dimension_numbers<[1], [0], [0], [1], [0, 0, 1, 1], [], []>} : vector<8x12xbf16>, vector<12x8xbf16>, vector<8x8xf32> -> vector<8x8xf32>
    %49 = arith.truncf %48 : vector<8x8xf32> to vector<8x8xbf16>
    %c0_33 = arith.constant 0 : index
    %c0_34 = arith.constant 0 : index
    %c0_35 = arith.constant 0 : index
    %50 = vector.load %arg11[%c0_33, %c0_34, %c0_35] : memref<1x32x8xbf16, #tpu.memory_space<vmem>>, vector<1x32x8xbf16>
    %51 = vector.shape_cast %50 : vector<1x32x8xbf16> to vector<32x8xbf16>
    %cst_36 = arith.constant dense<0.000000e+00> : vector<8x32xf32>
    %52 = tpu.matmul %49, %51, %cst_36 {dimension_numbers = #tpu.dot_dimension_numbers<[1], [1], [0], [0], [0, 0, 1, 0], [], []>} : vector<8x8xbf16>, vector<32x8xbf16>, vector<8x32xf32> -> vector<8x32xf32>
    %53 = arith.addf %9, %52 : vector<8x32xf32>
    %c0_37 = arith.constant 0 : index
    %c0_38 = arith.constant 0 : index
    %54 = vector.load %arg22[%c0_37, %c0_38] : memref<8x32xf32, #tpu.memory_space<vmem>>, vector<8x32xf32>
    tpu.vector_store %arg22[%c0_37, %c0_38], %53 {strides = array<i32>} : memref<8x32xf32, #tpu.memory_space<vmem>>, vector<8x32xf32>,
    %c3_i32 = arith.constant 3 : i32
    %55 = arith.cmpi eq, %arg2, %c3_i32 : i32
    %56 = arith.extui %55 : i1 to i32
    %c0_i32_39 = arith.constant 0 : i32
    %57 = arith.cmpi ne, %56, %c0_i32_39 : i32
    scf.if %57 {
      %c0_40 = arith.constant 0 : index
      %c0_41 = arith.constant 0 : index
      %58 = vector.load %arg22[%c0_40, %c0_41] : memref<8x32xf32, #tpu.memory_space<vmem>>, vector<8x32xf32>
      %59 = arith.addf %4, %58 : vector<8x32xf32>
      %c0_42 = arith.constant 0 : index
      %c0_43 = arith.constant 0 : index
      %60 = vector.load %arg12[%c0_42, %c0_43] : memref<1x32xf32, #tpu.memory_space<vmem>>, vector<1x32xf32>
      %61 = vector.broadcast %60 : vector<1x32xf32> to vector<8x32xf32>
      %62 = arith.addf %59, %61 : vector<8x32xf32>
      %c0_44 = arith.constant 0 : index
      %c0_45 = arith.constant 0 : index
      %63 = vector.load %arg13[%c0_44, %c0_45] : memref<1x32xf32, #tpu.memory_space<vmem>>, vector<1x32xf32>
      %c0_46 = arith.constant 0 : index
      %c0_47 = arith.constant 0 : index
      %64 = vector.load %arg14[%c0_46, %c0_47] : memref<1x32xf32, #tpu.memory_space<vmem>>, vector<1x32xf32>
      %cst_48 = arith.constant dense<0.000000e+00> : vector<8xf32>
      %65 = vector.multi_reduction <add>, %62, %cst_48 [1] : vector<8x32xf32> to vector<8xf32>
      %66 = vector.shape_cast %65 : vector<8xf32> to vector<8x1xf32>
      %cst_49 = arith.constant 3.200000e+01 : f32
      %67 = vector.broadcast %cst_49 : f32 to vector<8x1xf32>
      %68 = arith.divf %66, %67 : vector<8x1xf32>
      %69 = vector.broadcast %68 : vector<8x1xf32> to vector<8x32xf32>
      %70 = arith.subf %62, %69 : vector<8x32xf32>
      %71 = arith.mulf %70, %70 : vector<8x32xf32>
      %cst_50 = arith.constant dense<0.000000e+00> : vector<8xf32>
      %72 = vector.multi_reduction <add>, %71, %cst_50 [1] : vector<8x32xf32> to vector<8xf32>
      %73 = vector.shape_cast %72 : vector<8xf32> to vector<8x1xf32>
      %cst_51 = arith.constant 3.200000e+01 : f32
      %74 = vector.broadcast %cst_51 : f32 to vector<8x1xf32>
      %75 = arith.divf %73, %74 : vector<8x1xf32>
      %cst_52 = arith.constant 9.99999974E-6 : f32
      %76 = vector.broadcast %cst_52 : f32 to vector<8x1xf32>
      %77 = arith.addf %75, %76 : vector<8x1xf32>
      %78 = math.rsqrt %77 : vector<8x1xf32>
      %79 = vector.broadcast %78 : vector<8x1xf32> to vector<8x32xf32>
      %80 = arith.mulf %70, %79 : vector<8x32xf32>
      %81 = vector.broadcast %63 : vector<1x32xf32> to vector<8x32xf32>
      %82 = arith.mulf %80, %81 : vector<8x32xf32>
      %83 = vector.broadcast %64 : vector<1x32xf32> to vector<8x32xf32>
      %84 = arith.addf %82, %83 : vector<8x32xf32>
      %85 = arith.truncf %84 : vector<8x32xf32> to vector<8x32xbf16>
      %c0_53 = arith.constant 0 : index
      %c0_54 = arith.constant 0 : index
      %86 = vector.load %arg15[%c0_53, %c0_54] : memref<64x32xbf16, #tpu.memory_space<vmem>>, vector<64x32xbf16>
      %cst_55 = arith.constant dense<0.000000e+00> : vector<8x64xf32>
      %87 = tpu.matmul %85, %86, %cst_55 {dimension_numbers = #tpu.dot_dimension_numbers<[1], [1], [0], [0], [0, 0, 1, 0], [], []>} : vector<8x32xbf16>, vector<64x32xbf16>, vector<8x64xf32> -> vector<8x64xf32>
      %c0_56 = arith.constant 0 : index
      %c0_57 = arith.constant 0 : index
      %88 = vector.load %arg16[%c0_56, %c0_57] : memref<1x64xf32, #tpu.memory_space<vmem>>, vector<1x64xf32>
      %89 = vector.broadcast %88 : vector<1x64xf32> to vector<8x64xf32>
      %90 = arith.addf %87, %89 : vector<8x64xf32>
      %cst_58 = arith.constant 0.000000e+00 : f32
      %91 = vector.broadcast %cst_58 : f32 to vector<8x64xf32>
      %92 = arith.maximumf %90, %91 : vector<8x64xf32>
      %93 = arith.truncf %92 : vector<8x64xf32> to vector<8x64xbf16>
      %c0_59 = arith.constant 0 : index
      %c0_60 = arith.constant 0 : index
      %94 = vector.load %arg17[%c0_59, %c0_60] : memref<32x64xbf16, #tpu.memory_space<vmem>>, vector<32x64xbf16>
      %cst_61 = arith.constant dense<0.000000e+00> : vector<8x32xf32>
      %95 = tpu.matmul %93, %94, %cst_61 {dimension_numbers = #tpu.dot_dimension_numbers<[1], [1], [0], [0], [0, 0, 1, 0], [], []>} : vector<8x64xbf16>, vector<32x64xbf16>, vector<8x32xf32> -> vector<8x32xf32>
      %c0_62 = arith.constant 0 : index
      %c0_63 = arith.constant 0 : index
      %96 = vector.load %arg18[%c0_62, %c0_63] : memref<1x32xf32, #tpu.memory_space<vmem>>, vector<1x32xf32>
      %97 = vector.broadcast %96 : vector<1x32xf32> to vector<8x32xf32>
      %98 = arith.addf %95, %97 : vector<8x32xf32>
      %99 = arith.addf %84, %98 : vector<8x32xf32>
      %c0_64 = arith.constant 0 : index
      %c0_65 = arith.constant 0 : index
      %100 = vector.load %arg19[%c0_64, %c0_65] : memref<1x32xf32, #tpu.memory_space<vmem>>, vector<1x32xf32>
      %c0_66 = arith.constant 0 : index
      %c0_67 = arith.constant 0 : index
      %101 = vector.load %arg20[%c0_66, %c0_67] : memref<1x32xf32, #tpu.memory_space<vmem>>, vector<1x32xf32>
      %cst_68 = arith.constant dense<0.000000e+00> : vector<8xf32>
      %102 = vector.multi_reduction <add>, %99, %cst_68 [1] : vector<8x32xf32> to vector<8xf32>
      %103 = vector.shape_cast %102 : vector<8xf32> to vector<8x1xf32>
      %cst_69 = arith.constant 3.200000e+01 : f32
      %104 = vector.broadcast %cst_69 : f32 to vector<8x1xf32>
      %105 = arith.divf %103, %104 : vector<8x1xf32>
      %106 = vector.broadcast %105 : vector<8x1xf32> to vector<8x32xf32>
      %107 = arith.subf %99, %106 : vector<8x32xf32>
      %108 = arith.mulf %107, %107 : vector<8x32xf32>
      %cst_70 = arith.constant dense<0.000000e+00> : vector<8xf32>
      %109 = vector.multi_reduction <add>, %108, %cst_70 [1] : vector<8x32xf32> to vector<8xf32>
      %110 = vector.shape_cast %109 : vector<8xf32> to vector<8x1xf32>
      %cst_71 = arith.constant 3.200000e+01 : f32
      %111 = vector.broadcast %cst_71 : f32 to vector<8x1xf32>
      %112 = arith.divf %110, %111 : vector<8x1xf32>
      %cst_72 = arith.constant 9.99999974E-6 : f32
      %113 = vector.broadcast %cst_72 : f32 to vector<8x1xf32>
      %114 = arith.addf %112, %113 : vector<8x1xf32>
      %115 = math.rsqrt %114 : vector<8x1xf32>
      %116 = vector.broadcast %115 : vector<8x1xf32> to vector<8x32xf32>
      %117 = arith.mulf %107, %116 : vector<8x32xf32>
      %118 = vector.broadcast %100 : vector<1x32xf32> to vector<8x32xf32>
      %119 = arith.mulf %117, %118 : vector<8x32xf32>
      %120 = vector.broadcast %101 : vector<1x32xf32> to vector<8x32xf32>
      %121 = arith.addf %119, %120 : vector<8x32xf32>
      %c0_73 = arith.constant 0 : index
      %c0_74 = arith.constant 0 : index
      %c0_75 = arith.constant 0 : index
      %122 = vector.load %arg21[%c0_73, %c0_74, %c0_75] : memref<1x8x32xf32, #tpu.memory_space<vmem>>, vector<1x8x32xf32>
      %123 = vector.shape_cast %122 : vector<1x8x32xf32> to vector<8x32xf32>
      %124 = vector.shape_cast %121 : vector<8x32xf32> to vector<1x8x32xf32>
      tpu.vector_store %arg21[%c0_73, %c0_74, %c0_75], %124 {strides = array<i32>} : memref<1x8x32xf32, #tpu.memory_space<vmem>>, vector<1x8x32xf32>,
    } else {
    }
    return
  }
  func.func @transform_0(%arg0: i32, %arg1: i32, %arg2: i32) -> (i32, i32, i32) {
    %c0_i32 = arith.constant 0 : i32
    %c0_i32_0 = arith.constant 0 : i32
    return %arg0, %arg1, %c0_i32 : i32, i32, i32
  }
  func.func @transform_1(%arg0: i32, %arg1: i32, %arg2: i32) -> (i32, i32, i32) {
    %c0_i32 = arith.constant 0 : i32
    %c0_i32_0 = arith.constant 0 : i32
    %c0_i32_1 = arith.constant 0 : i32
    return %arg0, %c0_i32, %c0_i32_0 : i32, i32, i32
  }
  func.func @transform_2(%arg0: i32, %arg1: i32, %arg2: i32) -> (i32, i32, i32) {
    %c0_i32 = arith.constant 0 : i32
    %c0_i32_0 = arith.constant 0 : i32
    %c0_i32_1 = arith.constant 0 : i32
    return %arg2, %c0_i32, %c0_i32_0 : i32, i32, i32
  }
  func.func @transform_3(%arg0: i32, %arg1: i32, %arg2: i32) -> (i32, i32, i32) {
    %c0_i32 = arith.constant 0 : i32
    %c0_i32_0 = arith.constant 0 : i32
    %c0_i32_1 = arith.constant 0 : i32
    return %arg2, %c0_i32, %c0_i32_0 : i32, i32, i32
  }
  func.func @transform_4(%arg0: i32, %arg1: i32, %arg2: i32) -> (i32, i32, i32) {
    %c0_i32 = arith.constant 0 : i32
    %c0_i32_0 = arith.constant 0 : i32
    %c0_i32_1 = arith.constant 0 : i32
    return %arg2, %c0_i32, %c0_i32_0 : i32, i32, i32
  }
  func.func @transform_5(%arg0: i32, %arg1: i32, %arg2: i32) -> (i32, i32, i32) {
    %c0_i32 = arith.constant 0 : i32
    %c0_i32_0 = arith.constant 0 : i32
    %c0_i32_1 = arith.constant 0 : i32
    return %arg2, %c0_i32, %c0_i32_0 : i32, i32, i32
  }
  func.func @transform_6(%arg0: i32, %arg1: i32, %arg2: i32) -> (i32, i32, i32) {
    %c0_i32 = arith.constant 0 : i32
    %c0_i32_0 = arith.constant 0 : i32
    %c0_i32_1 = arith.constant 0 : i32
    return %arg2, %c0_i32, %c0_i32_0 : i32, i32, i32
  }
  func.func @transform_7(%arg0: i32, %arg1: i32, %arg2: i32) -> (i32, i32, i32) {
    %c0_i32 = arith.constant 0 : i32
    %c0_i32_0 = arith.constant 0 : i32
    %c0_i32_1 = arith.constant 0 : i32
    return %arg2, %c0_i32, %c0_i32_0 : i32, i32, i32
  }
  func.func @transform_8(%arg0: i32, %arg1: i32, %arg2: i32) -> (i32, i32, i32) {
    %c0_i32 = arith.constant 0 : i32
    %c0_i32_0 = arith.constant 0 : i32
    %c0_i32_1 = arith.constant 0 : i32
    return %arg2, %c0_i32, %c0_i32_0 : i32, i32, i32
  }
  func.func @transform_9(%arg0: i32, %arg1: i32, %arg2: i32) -> (i32, i32) {
    %c0_i32 = arith.constant 0 : i32
    %c0_i32_0 = arith.constant 0 : i32
    %c0_i32_1 = arith.constant 0 : i32
    return %c0_i32, %c0_i32_0 : i32, i32
  }
  func.func @transform_10(%arg0: i32, %arg1: i32, %arg2: i32) -> (i32, i32) {
    %c0_i32 = arith.constant 0 : i32
    %c0_i32_0 = arith.constant 0 : i32
    %c0_i32_1 = arith.constant 0 : i32
    return %c0_i32, %c0_i32_0 : i32, i32
  }
  func.func @transform_11(%arg0: i32, %arg1: i32, %arg2: i32) -> (i32, i32) {
    %c0_i32 = arith.constant 0 : i32
    %c0_i32_0 = arith.constant 0 : i32
    %c0_i32_1 = arith.constant 0 : i32
    return %c0_i32, %c0_i32_0 : i32, i32
  }
  func.func @transform_12(%arg0: i32, %arg1: i32, %arg2: i32) -> (i32, i32) {
    %c0_i32 = arith.constant 0 : i32
    %c0_i32_0 = arith.constant 0 : i32
    %c0_i32_1 = arith.constant 0 : i32
    return %c0_i32, %c0_i32_0 : i32, i32
  }
  func.func @transform_13(%arg0: i32, %arg1: i32, %arg2: i32) -> (i32, i32) {
    %c0_i32 = arith.constant 0 : i32
    %c0_i32_0 = arith.constant 0 : i32
    %c0_i32_1 = arith.constant 0 : i32
    return %c0_i32, %c0_i32_0 : i32, i32
  }
  func.func @transform_14(%arg0: i32, %arg1: i32, %arg2: i32) -> (i32, i32) {
    %c0_i32 = arith.constant 0 : i32
    %c0_i32_0 = arith.constant 0 : i32
    %c0_i32_1 = arith.constant 0 : i32
    return %c0_i32, %c0_i32_0 : i32, i32
  }
  func.func @transform_15(%arg0: i32, %arg1: i32, %arg2: i32) -> (i32, i32) {
    %c0_i32 = arith.constant 0 : i32
    %c0_i32_0 = arith.constant 0 : i32
    %c0_i32_1 = arith.constant 0 : i32
    return %c0_i32, %c0_i32_0 : i32, i32
  }
  func.func @transform_16(%arg0: i32, %arg1: i32, %arg2: i32) -> (i32, i32) {
    %c0_i32 = arith.constant 0 : i32
    %c0_i32_0 = arith.constant 0 : i32
    %c0_i32_1 = arith.constant 0 : i32
    return %c0_i32, %c0_i32_0 : i32, i32
  }
  func.func @transform_17(%arg0: i32, %arg1: i32, %arg2: i32) -> (i32, i32) {
    %c0_i32 = arith.constant 0 : i32
    %c0_i32_0 = arith.constant 0 : i32
    %c0_i32_1 = arith.constant 0 : i32
    return %c0_i32, %c0_i32_0 : i32, i32
  }
  func.func @transform_18(%arg0: i32, %arg1: i32, %arg2: i32) -> (i32, i32, i32) {
    %c0_i32 = arith.constant 0 : i32
    %c0_i32_0 = arith.constant 0 : i32
    return %arg0, %arg1, %c0_i32 : i32, i32, i32
  }
}

module attributes {stable_mosaic.version = 11 : i64} {
  func.func @_self_attn_kernel(%arg0: i32, %arg1: i32, %arg2: i32, %arg3: memref<1x8x32xf32, #tpu.memory_space<vmem>>, %arg4: memref<1x8x32xbf16, #tpu.memory_space<vmem>>, %arg5: memref<1x1x8xf32, #tpu.memory_space<vmem>>, %arg6: memref<1x8x32xbf16, #tpu.memory_space<vmem>>, %arg7: memref<1x1x8xf32, #tpu.memory_space<vmem>>, %arg8: memref<1x8x32xbf16, #tpu.memory_space<vmem>>, %arg9: memref<1x1x8xf32, #tpu.memory_space<vmem>>, %arg10: memref<1x32x8xbf16, #tpu.memory_space<vmem>>, %arg11: memref<1x32xf32, #tpu.memory_space<vmem>>, %arg12: memref<1x32xf32, #tpu.memory_space<vmem>>, %arg13: memref<1x32xf32, #tpu.memory_space<vmem>>, %arg14: memref<1x8x32xf32, #tpu.memory_space<vmem>>, %arg15: memref<8x32xf32, #tpu.memory_space<vmem>>) attributes {dimension_semantics = [#tpu.dimension_semantics<parallel>, #tpu.dimension_semantics<parallel>, #tpu.dimension_semantics<arbitrary>], iteration_bounds = array<i64: 2, 1, 4>, scalar_prefetch = 0 : i64, scratch_operands = 1 : i64, tpu.core_type = #tpu.core_type<tc>, window_params = [{transform_indices = @transform_0, window_bounds = array<i64: 1, 8, 32>}, {transform_indices = @transform_1, window_bounds = array<i64: 1, 8, 32>}, {transform_indices = @transform_2, window_bounds = array<i64: 1, 1, 8>}, {transform_indices = @transform_3, window_bounds = array<i64: 1, 8, 32>}, {transform_indices = @transform_4, window_bounds = array<i64: 1, 1, 8>}, {transform_indices = @transform_5, window_bounds = array<i64: 1, 8, 32>}, {transform_indices = @transform_6, window_bounds = array<i64: 1, 1, 8>}, {transform_indices = @transform_7, window_bounds = array<i64: 1, 32, 8>}, {pipeline_mode = #tpu.pipeline_mode<synchronous>, transform_indices = @transform_8, window_bounds = array<i64: 1, 32>}, {pipeline_mode = #tpu.pipeline_mode<synchronous>, transform_indices = @transform_9, window_bounds = array<i64: 1, 32>}, {pipeline_mode = #tpu.pipeline_mode<synchronous>, transform_indices = @transform_10, window_bounds = array<i64: 1, 32>}, {transform_indices = @transform_11, window_bounds = array<i64: 1, 8, 32>}]} {
    %c0_i32 = arith.constant 0 : i32
    %0 = arith.cmpi eq, %arg2, %c0_i32 : i32
    %1 = arith.extui %0 : i1 to i32
    %c0_i32_0 = arith.constant 0 : i32
    %2 = arith.cmpi ne, %1, %c0_i32_0 : i32
    scf.if %2 {
      %cst_41 = arith.constant 0.000000e+00 : f32
      %70 = vector.broadcast %cst_41 : f32 to vector<8x32xf32>
      %c0_42 = arith.constant 0 : index
      %c0_43 = arith.constant 0 : index
      %71 = vector.load %arg15[%c0_42, %c0_43] : memref<8x32xf32, #tpu.memory_space<vmem>>, vector<8x32xf32>
      tpu.vector_store %arg15[%c0_42, %c0_43], %70 {strides = array<i32>} : memref<8x32xf32, #tpu.memory_space<vmem>>, vector<8x32xf32>,
    } else {
    }
    %c8_i32 = arith.constant 8 : i32
    %3 = arith.muli %arg1, %c8_i32 : i32
    %4 = tpu.assume_multiple %3, 8 : i32
    %c0 = arith.constant 0 : index
    %5 = arith.index_cast %4 : i32 to index
    %c0_1 = arith.constant 0 : index
    %6 = vector.load %arg3[%c0, %5, %c0_1] : memref<1x8x32xf32, #tpu.memory_space<vmem>>, vector<1x8x32xf32>
    %7 = vector.shape_cast %6 : vector<1x8x32xf32> to vector<8x32xf32>
    %c0_2 = arith.constant 0 : index
    %c0_3 = arith.constant 0 : index
    %c0_4 = arith.constant 0 : index
    %8 = vector.load %arg3[%c0_2, %c0_3, %c0_4] : memref<1x8x32xf32, #tpu.memory_space<vmem>>, vector<1x8x32xf32>
    %9 = vector.shape_cast %8 : vector<1x8x32xf32> to vector<8x32xf32>
    %10 = arith.truncf %9 : vector<8x32xf32> to vector<8x32xbf16>
    %11 = arith.truncf %7 : vector<8x32xf32> to vector<8x32xbf16>
    %c0_5 = arith.constant 0 : index
    %c0_6 = arith.constant 0 : index
    %12 = vector.load %arg15[%c0_5, %c0_6] : memref<8x32xf32, #tpu.memory_space<vmem>>, vector<8x32xf32>
    %c0_7 = arith.constant 0 : index
    %c0_8 = arith.constant 0 : index
    %c0_9 = arith.constant 0 : index
    %13 = vector.load %arg4[%c0_7, %c0_8, %c0_9] : memref<1x8x32xbf16, #tpu.memory_space<vmem>>, vector<1x8x32xbf16>
    %14 = vector.shape_cast %13 : vector<1x8x32xbf16> to vector<8x32xbf16>
    %cst = arith.constant dense<0.000000e+00> : vector<8x8xf32>
    %15 = tpu.matmul %11, %14, %cst {dimension_numbers = #tpu.dot_dimension_numbers<[1], [1], [0], [0], [0, 0, 1, 0], [], []>} : vector<8x32xbf16>, vector<8x32xbf16>, vector<8x8xf32> -> vector<8x8xf32>
    %c0_10 = arith.constant 0 : index
    %c0_11 = arith.constant 0 : index
    %c0_12 = arith.constant 0 : index
    %16 = vector.load %arg5[%c0_10, %c0_11, %c0_12] : memref<1x1x8xf32, #tpu.memory_space<vmem>>, vector<1x1x8xf32>
    %17 = vector.shape_cast %16 : vector<1x1x8xf32> to vector<1x8xf32>
    %18 = vector.broadcast %17 : vector<1x8xf32> to vector<8x8xf32>
    %19 = arith.addf %15, %18 : vector<8x8xf32>
    %c0_13 = arith.constant 0 : index
    %c0_14 = arith.constant 0 : index
    %c0_15 = arith.constant 0 : index
    %20 = vector.load %arg6[%c0_13, %c0_14, %c0_15] : memref<1x8x32xbf16, #tpu.memory_space<vmem>>, vector<1x8x32xbf16>
    %21 = vector.shape_cast %20 : vector<1x8x32xbf16> to vector<8x32xbf16>
    %cst_16 = arith.constant dense<0.000000e+00> : vector<8x8xf32>
    %22 = tpu.matmul %10, %21, %cst_16 {dimension_numbers = #tpu.dot_dimension_numbers<[1], [1], [0], [0], [0, 0, 1, 0], [], []>} : vector<8x32xbf16>, vector<8x32xbf16>, vector<8x8xf32> -> vector<8x8xf32>
    %c0_17 = arith.constant 0 : index
    %c0_18 = arith.constant 0 : index
    %c0_19 = arith.constant 0 : index
    %23 = vector.load %arg7[%c0_17, %c0_18, %c0_19] : memref<1x1x8xf32, #tpu.memory_space<vmem>>, vector<1x1x8xf32>
    %24 = vector.shape_cast %23 : vector<1x1x8xf32> to vector<1x8xf32>
    %25 = vector.broadcast %24 : vector<1x8xf32> to vector<8x8xf32>
    %26 = arith.addf %22, %25 : vector<8x8xf32>
    %c0_20 = arith.constant 0 : index
    %c0_21 = arith.constant 0 : index
    %c0_22 = arith.constant 0 : index
    %27 = vector.load %arg8[%c0_20, %c0_21, %c0_22] : memref<1x8x32xbf16, #tpu.memory_space<vmem>>, vector<1x8x32xbf16>
    %28 = vector.shape_cast %27 : vector<1x8x32xbf16> to vector<8x32xbf16>
    %cst_23 = arith.constant dense<0.000000e+00> : vector<8x8xf32>
    %29 = tpu.matmul %10, %28, %cst_23 {dimension_numbers = #tpu.dot_dimension_numbers<[1], [1], [0], [0], [0, 0, 1, 0], [], []>} : vector<8x32xbf16>, vector<8x32xbf16>, vector<8x8xf32> -> vector<8x8xf32>
    %c0_24 = arith.constant 0 : index
    %c0_25 = arith.constant 0 : index
    %c0_26 = arith.constant 0 : index
    %30 = vector.load %arg9[%c0_24, %c0_25, %c0_26] : memref<1x1x8xf32, #tpu.memory_space<vmem>>, vector<1x1x8xf32>
    %31 = vector.shape_cast %30 : vector<1x1x8xf32> to vector<1x8xf32>
    %32 = vector.broadcast %31 : vector<1x8xf32> to vector<8x8xf32>
    %33 = arith.addf %29, %32 : vector<8x8xf32>
    %34 = arith.truncf %19 : vector<8x8xf32> to vector<8x8xbf16>
    %35 = arith.truncf %26 : vector<8x8xf32> to vector<8x8xbf16>
    %cst_27 = arith.constant dense<0.000000e+00> : vector<8x8xf32>
    %36 = tpu.matmul %34, %35, %cst_27 {dimension_numbers = #tpu.dot_dimension_numbers<[1], [1], [0], [0], [0, 0, 1, 0], [], []>} : vector<8x8xbf16>, vector<8x8xbf16>, vector<8x8xf32> -> vector<8x8xf32>
    %cst_28 = arith.constant 0.353553385 : f32
    %37 = vector.broadcast %cst_28 : f32 to vector<8x8xf32>
    %38 = arith.mulf %36, %37 : vector<8x8xf32>
    %39 = tpu.iota {dimensions = array<i32: 0>} : vector<8x8xi32>
    %40 = vector.broadcast %4 : i32 to vector<8x8xi32>
    %41 = arith.addi %40, %39 : vector<8x8xi32>
    %42 = tpu.iota {dimensions = array<i32: 1>} : vector<8x8xi32>
    %43 = arith.cmpi sle, %42, %41 : vector<8x8xi32>
    %cst_29 = arith.constant 0.000000e+00 : f32
    %cst_30 = arith.constant -1.000000e+30 : f32
    %44 = vector.broadcast %cst_29 : f32 to vector<8x8xf32>
    %45 = vector.broadcast %cst_30 : f32 to vector<8x8xf32>
    %46 = arith.select %43, %44, %45 : vector<8x8xi1>, vector<8x8xf32>
    %47 = arith.addf %38, %46 : vector<8x8xf32>
    %cst_31 = arith.constant dense<0xFF800000> : vector<8xf32>
    %48 = vector.multi_reduction <maximumf>, %47, %cst_31 [1] : vector<8x8xf32> to vector<8xf32>
    %49 = vector.shape_cast %48 : vector<8xf32> to vector<8x1xf32>
    %50 = vector.broadcast %49 : vector<8x1xf32> to vector<8x8xf32>
    %51 = arith.subf %47, %50 : vector<8x8xf32>
    %52 = math.exp %51 : vector<8x8xf32>
    %cst_32 = arith.constant dense<0.000000e+00> : vector<8xf32>
    %53 = vector.multi_reduction <add>, %52, %cst_32 [1] : vector<8x8xf32> to vector<8xf32>
    %54 = vector.shape_cast %53 : vector<8xf32> to vector<8x1xf32>
    %55 = tpu.reciprocal %54 {approx = true} : vector<8x1xf32> -> vector<8x1xf32>
    %56 = vector.broadcast %55 : vector<8x1xf32> to vector<8x8xf32>
    %57 = arith.mulf %52, %56 : vector<8x8xf32>
    %58 = arith.truncf %57 : vector<8x8xf32> to vector<8x8xbf16>
    %59 = arith.truncf %33 : vector<8x8xf32> to vector<8x8xbf16>
    %cst_33 = arith.constant dense<0.000000e+00> : vector<8x8xf32>
    %60 = tpu.matmul %58, %59, %cst_33 {dimension_numbers = #tpu.dot_dimension_numbers<[1], [0], [0], [1], [0, 0, 1, 1], [], []>} : vector<8x8xbf16>, vector<8x8xbf16>, vector<8x8xf32> -> vector<8x8xf32>
    %61 = arith.truncf %60 : vector<8x8xf32> to vector<8x8xbf16>
    %c0_34 = arith.constant 0 : index
    %c0_35 = arith.constant 0 : index
    %c0_36 = arith.constant 0 : index
    %62 = vector.load %arg10[%c0_34, %c0_35, %c0_36] : memref<1x32x8xbf16, #tpu.memory_space<vmem>>, vector<1x32x8xbf16>
    %63 = vector.shape_cast %62 : vector<1x32x8xbf16> to vector<32x8xbf16>
    %cst_37 = arith.constant dense<0.000000e+00> : vector<8x32xf32>
    %64 = tpu.matmul %61, %63, %cst_37 {dimension_numbers = #tpu.dot_dimension_numbers<[1], [1], [0], [0], [0, 0, 1, 0], [], []>} : vector<8x8xbf16>, vector<32x8xbf16>, vector<8x32xf32> -> vector<8x32xf32>
    %65 = arith.addf %12, %64 : vector<8x32xf32>
    %c0_38 = arith.constant 0 : index
    %c0_39 = arith.constant 0 : index
    %66 = vector.load %arg15[%c0_38, %c0_39] : memref<8x32xf32, #tpu.memory_space<vmem>>, vector<8x32xf32>
    tpu.vector_store %arg15[%c0_38, %c0_39], %65 {strides = array<i32>} : memref<8x32xf32, #tpu.memory_space<vmem>>, vector<8x32xf32>,
    %c3_i32 = arith.constant 3 : i32
    %67 = arith.cmpi eq, %arg2, %c3_i32 : i32
    %68 = arith.extui %67 : i1 to i32
    %c0_i32_40 = arith.constant 0 : i32
    %69 = arith.cmpi ne, %68, %c0_i32_40 : i32
    scf.if %69 {
      %c0_41 = arith.constant 0 : index
      %c0_42 = arith.constant 0 : index
      %70 = vector.load %arg15[%c0_41, %c0_42] : memref<8x32xf32, #tpu.memory_space<vmem>>, vector<8x32xf32>
      %71 = arith.addf %7, %70 : vector<8x32xf32>
      %c0_43 = arith.constant 0 : index
      %c0_44 = arith.constant 0 : index
      %72 = vector.load %arg11[%c0_43, %c0_44] : memref<1x32xf32, #tpu.memory_space<vmem>>, vector<1x32xf32>
      %73 = vector.broadcast %72 : vector<1x32xf32> to vector<8x32xf32>
      %74 = arith.addf %71, %73 : vector<8x32xf32>
      %c0_45 = arith.constant 0 : index
      %c0_46 = arith.constant 0 : index
      %75 = vector.load %arg12[%c0_45, %c0_46] : memref<1x32xf32, #tpu.memory_space<vmem>>, vector<1x32xf32>
      %c0_47 = arith.constant 0 : index
      %c0_48 = arith.constant 0 : index
      %76 = vector.load %arg13[%c0_47, %c0_48] : memref<1x32xf32, #tpu.memory_space<vmem>>, vector<1x32xf32>
      %cst_49 = arith.constant dense<0.000000e+00> : vector<8xf32>
      %77 = vector.multi_reduction <add>, %74, %cst_49 [1] : vector<8x32xf32> to vector<8xf32>
      %78 = vector.shape_cast %77 : vector<8xf32> to vector<8x1xf32>
      %cst_50 = arith.constant 3.200000e+01 : f32
      %79 = vector.broadcast %cst_50 : f32 to vector<8x1xf32>
      %80 = arith.divf %78, %79 : vector<8x1xf32>
      %81 = vector.broadcast %80 : vector<8x1xf32> to vector<8x32xf32>
      %82 = arith.subf %74, %81 : vector<8x32xf32>
      %83 = arith.mulf %82, %82 : vector<8x32xf32>
      %cst_51 = arith.constant dense<0.000000e+00> : vector<8xf32>
      %84 = vector.multi_reduction <add>, %83, %cst_51 [1] : vector<8x32xf32> to vector<8xf32>
      %85 = vector.shape_cast %84 : vector<8xf32> to vector<8x1xf32>
      %cst_52 = arith.constant 3.200000e+01 : f32
      %86 = vector.broadcast %cst_52 : f32 to vector<8x1xf32>
      %87 = arith.divf %85, %86 : vector<8x1xf32>
      %cst_53 = arith.constant 9.99999974E-6 : f32
      %88 = vector.broadcast %cst_53 : f32 to vector<8x1xf32>
      %89 = arith.addf %87, %88 : vector<8x1xf32>
      %90 = math.rsqrt %89 : vector<8x1xf32>
      %91 = vector.broadcast %90 : vector<8x1xf32> to vector<8x32xf32>
      %92 = arith.mulf %82, %91 : vector<8x32xf32>
      %93 = vector.broadcast %75 : vector<1x32xf32> to vector<8x32xf32>
      %94 = arith.mulf %92, %93 : vector<8x32xf32>
      %95 = vector.broadcast %76 : vector<1x32xf32> to vector<8x32xf32>
      %96 = arith.addf %94, %95 : vector<8x32xf32>
      %c0_54 = arith.constant 0 : index
      %c0_55 = arith.constant 0 : index
      %c0_56 = arith.constant 0 : index
      %97 = vector.load %arg14[%c0_54, %c0_55, %c0_56] : memref<1x8x32xf32, #tpu.memory_space<vmem>>, vector<1x8x32xf32>
      %98 = vector.shape_cast %97 : vector<1x8x32xf32> to vector<8x32xf32>
      %99 = vector.shape_cast %96 : vector<8x32xf32> to vector<1x8x32xf32>
      tpu.vector_store %arg14[%c0_54, %c0_55, %c0_56], %99 {strides = array<i32>} : memref<1x8x32xf32, #tpu.memory_space<vmem>>, vector<1x8x32xf32>,
    } else {
    }
    return
  }
  func.func @transform_0(%arg0: i32, %arg1: i32, %arg2: i32) -> (i32, i32, i32) {
    %c0_i32 = arith.constant 0 : i32
    %c0_i32_0 = arith.constant 0 : i32
    %c0_i32_1 = arith.constant 0 : i32
    return %arg0, %c0_i32, %c0_i32_0 : i32, i32, i32
  }
  func.func @transform_1(%arg0: i32, %arg1: i32, %arg2: i32) -> (i32, i32, i32) {
    %c0_i32 = arith.constant 0 : i32
    %c0_i32_0 = arith.constant 0 : i32
    %c0_i32_1 = arith.constant 0 : i32
    return %arg2, %c0_i32, %c0_i32_0 : i32, i32, i32
  }
  func.func @transform_2(%arg0: i32, %arg1: i32, %arg2: i32) -> (i32, i32, i32) {
    %c0_i32 = arith.constant 0 : i32
    %c0_i32_0 = arith.constant 0 : i32
    %c0_i32_1 = arith.constant 0 : i32
    return %arg2, %c0_i32, %c0_i32_0 : i32, i32, i32
  }
  func.func @transform_3(%arg0: i32, %arg1: i32, %arg2: i32) -> (i32, i32, i32) {
    %c0_i32 = arith.constant 0 : i32
    %c0_i32_0 = arith.constant 0 : i32
    %c0_i32_1 = arith.constant 0 : i32
    return %arg2, %c0_i32, %c0_i32_0 : i32, i32, i32
  }
  func.func @transform_4(%arg0: i32, %arg1: i32, %arg2: i32) -> (i32, i32, i32) {
    %c0_i32 = arith.constant 0 : i32
    %c0_i32_0 = arith.constant 0 : i32
    %c0_i32_1 = arith.constant 0 : i32
    return %arg2, %c0_i32, %c0_i32_0 : i32, i32, i32
  }
  func.func @transform_5(%arg0: i32, %arg1: i32, %arg2: i32) -> (i32, i32, i32) {
    %c0_i32 = arith.constant 0 : i32
    %c0_i32_0 = arith.constant 0 : i32
    %c0_i32_1 = arith.constant 0 : i32
    return %arg2, %c0_i32, %c0_i32_0 : i32, i32, i32
  }
  func.func @transform_6(%arg0: i32, %arg1: i32, %arg2: i32) -> (i32, i32, i32) {
    %c0_i32 = arith.constant 0 : i32
    %c0_i32_0 = arith.constant 0 : i32
    %c0_i32_1 = arith.constant 0 : i32
    return %arg2, %c0_i32, %c0_i32_0 : i32, i32, i32
  }
  func.func @transform_7(%arg0: i32, %arg1: i32, %arg2: i32) -> (i32, i32, i32) {
    %c0_i32 = arith.constant 0 : i32
    %c0_i32_0 = arith.constant 0 : i32
    %c0_i32_1 = arith.constant 0 : i32
    return %arg2, %c0_i32, %c0_i32_0 : i32, i32, i32
  }
  func.func @transform_8(%arg0: i32, %arg1: i32, %arg2: i32) -> (i32, i32) {
    %c0_i32 = arith.constant 0 : i32
    %c0_i32_0 = arith.constant 0 : i32
    %c0_i32_1 = arith.constant 0 : i32
    return %c0_i32, %c0_i32_0 : i32, i32
  }
  func.func @transform_9(%arg0: i32, %arg1: i32, %arg2: i32) -> (i32, i32) {
    %c0_i32 = arith.constant 0 : i32
    %c0_i32_0 = arith.constant 0 : i32
    %c0_i32_1 = arith.constant 0 : i32
    return %c0_i32, %c0_i32_0 : i32, i32
  }
  func.func @transform_10(%arg0: i32, %arg1: i32, %arg2: i32) -> (i32, i32) {
    %c0_i32 = arith.constant 0 : i32
    %c0_i32_0 = arith.constant 0 : i32
    %c0_i32_1 = arith.constant 0 : i32
    return %c0_i32, %c0_i32_0 : i32, i32
  }
  func.func @transform_11(%arg0: i32, %arg1: i32, %arg2: i32) -> (i32, i32, i32) {
    %c0_i32 = arith.constant 0 : i32
    %c0_i32_0 = arith.constant 0 : i32
    return %arg0, %arg1, %c0_i32 : i32, i32, i32
  }
}

</mosaic_0001>

<bundles_post_ra>
// kernel: transformer_decoder_forward.9
= control target key start
LH: loop header
LB: loop body
LE: loop exit
PB: predicated region body
PF: predicated region fallthrough
CT: control target
= control target key end

     0   :  { %vm81_vm0 = vcmask 261120   ;;  %v205_v0 = vmov 0.0   ;;  %vm206_vm1 = vmmov 0   ;;  %s275_s1 = inlined_call_operand.vmem [shape: bf16[128,32], index: 1, kind: input, shape index: {}]   ;;  %s276_s0 = inlined_call_operand.vmem [shape: f32[16,32], index: 0, kind: input, shape index: {}]   ;;  %s277_s2 = inlined_call_operand.vmem [shape: f32[1,128], index: 2, kind: input, shape index: {}]   ;;  %s278_s3 = inlined_call_operand.vmem [shape: f32[16,128], index: 3, kind: output, shape index: {}]  }
   0x1   :  { %175 = vmatprep.subr.bf16.mxu0 %v205_v0  ;;  %v197_v1 = vld [vmem:[%s275_s1 + $0x38] sm:$0xff]   ;;  %191 = vmatprep.mubr.msk.bf16.mxu0 %vm206_vm1, %v205_v0  ;;  %v198_v3 = vld [vmem:[%s275_s1 + $0x30] sm:$0xff]   ;;  %v199_v5 = vld [vmem:[%s275_s1 + $0x28] sm:$0xff]  }
   0x2   :  { %v107_v2 = vsel %vm81_vm0, %v197_v1, 0  ;;  %v104_v4 = vsel %vm81_vm0, %v198_v3, 0  ;;  %v101_v6 = vsel %vm81_vm0, %v199_v5, 0  ;;  %v200_v7 = vld [vmem:[%s275_s1 + $0x20] sm:$0xff]   ;;  %v201_v9 = vld [vmem:[%s275_s1 + $0x18] sm:$0xff]   ;;  %v202_v11 = vld [vmem:[%s275_s1 + $0x10] sm:$0xff]  }
   0x3   :  { %176 = vmatpush3.bf16.xpose.msra.mxu0 %v107_v2  ;;  %v98_v8 = vsel %vm81_vm0, %v200_v7, 0  ;;  %v95_v10 = vsel %vm81_vm0, %v201_v9, 0  ;;  %v92_v12 = vsel %vm81_vm0, %v202_v11, 0  ;;  %v203_v13 = vld [vmem:[%s275_s1 + $0x8] sm:$0xff]   ;;  %v204_v15 = vld [vmem:[%s275_s1] sm:$0xff]  }
   0x4   :  { %177 = vmatprep.subr.bf16.mxu0 %v205_v0  ;;  %v89_v14 = vsel %vm81_vm0, %v203_v13, 0  ;;  %v86_v16 = vsel %vm81_vm0, %v204_v15, 0  ;;  %v15_v17 = vld [vmem:[%s276_s0] sm:$0xff]  ;;  %v16_v18 = vld [vmem:[%s276_s0 + $0x8] sm:$0xff] }
   0x5   :  { %v17_v19 = vpack.c.bf16 %v16_v18, %v15_v17  ;;  %v156_v20 = vld [vmem:[%s277_s2] ss:$0 sm:$0xff] }
   0xb   :  { %178 = vmatpush3.bf16.xpose.msra.mxu0 %v104_v4 }
   0xc   :  { %179 = vmatprep.subr.bf16.mxu0 %v205_v0 }
  0x13   :  { %180 = vmatpush3.bf16.xpose.msra.mxu0 %v101_v6 }
  0x14   :  { %181 = vmatprep.subr.bf16.mxu0 %v205_v0 }
  0x1b   :  { %182 = vmatpush3.bf16.xpose.msra.mxu0 %v98_v8 }
  0x1c   :  { %183 = vmatprep.subr.bf16.mxu0 %v205_v0 }
  0x23   :  { %184 = vmatpush3.bf16.xpose.msra.mxu0 %v95_v10 }
  0x24   :  { %185 = vmatprep.subr.bf16.mxu0 %v205_v0 }
  0x2b   :  { %186 = vmatpush3.bf16.xpose.msra.mxu0 %v92_v12 }
  0x2c   :  { %187 = vmatprep.subr.bf16.mxu0 %v205_v0 }
  0x33   :  { %188 = vmatpush3.bf16.xpose.msra.mxu0 %v89_v14 }
  0x34   :  { %189 = vmatprep.subr.bf16.mxu0 %v205_v0 }
  0x3b   :  { %190 = vmatpush3.bf16.xpose.msra.mxu0 %v86_v16 }
  0x42   :  { %192 = vmatmul.mubr.msk.bf16.vlgmr.msra.gmra.mxu0 %vm81_vm0, %v17_v19 }
 0x102   :  { %v143_v21 = vpop.f32.mrf.mxu0 }
 0x103   :  { %v144_v22 = vadd.f32 %v156_v20, %v143_v21 }
 0x104   :  { %v193_v23 = vpop.f32.mrf.mxu0 }
 0x105   :  { %150 = vst [vmem:[%s278_s3] sm:$0xff] %v144_v22 }
 0x106   :  { %v146_v24 = vpop.f32.mrf.mxu0 }
 0x107   :  { %v147_v25 = vadd.f32 %v156_v20, %v146_v24 }
 0x108   :  { %v194_v26 = vpop.f32.mrf.mxu0 }
 0x109   :  { %151 = vst [vmem:[%s278_s3 + $0x8] sm:$0xff] %v147_v25 }

// kernel: transformer_decoder_forward.5
= control target key start
LH: loop header
LB: loop body
LE: loop exit
PB: predicated region body
PF: predicated region fallthrough
CT: control target
= control target key end

     0   :  { %s1318_s17 = smov 0   ;;  %s1320_s18 = smov 0   ;;  %s1486_s0 = inlined_call_operand.vmem [shape: f32[2,8,32], index: 0, kind: input, shape index: {}]   ;;  %s1487_s1 = inlined_call_operand.vmem [shape: bf16[4,8,32], index: 1, kind: input, shape index: {}]   ;;  %s1488_s2 = inlined_call_operand.vmem [shape: f32[4,1,8], index: 2, kind: input, shape index: {}]   ;;  %s1489_s3 = inlined_call_operand.vmem [shape: bf16[4,8,32], index: 3, kind: input, shape index: {}]   ;;  %s1490_s4 = inlined_call_operand.vmem [shape: f32[4,1,8], index: 4, kind: input, shape index: {}]   ;;  %s1491_s5 = inlined_call_operand.vmem [shape: bf16[4,8,32], index: 5, kind: input, shape index: {}]   ;;  %s1492_s6 = inlined_call_operand.vmem [shape: f32[4,1,8], index: 6, kind: input, shape index: {}]   ;;  %s1493_s7 = inlined_call_operand.vmem [shape: bf16[4,32,8], index: 7, kind: input, shape index: {}]   ;;  %s1494_s8 = inlined_call_operand.vmem [shape: f32[1,32], index: 8, kind: input, shape index: {}]   ;;  %s1495_s9 = inlined_call_operand.vmem [shape: f32[1,32], index: 9, kind: input, shape index: {}]   ;;  %s1496_s10 = inlined_call_operand.vmem [shape: f32[1,32], index: 10, kind: input, shape index: {}]   ;;  %s1497_s11 = inlined_call_operand.vmem [shape: f32[2,8,32], index: 11, kind: output, shape index: {}]  }
   0x1   :  { %1501 = sst [smem:[#allocation8_spill]] %s1486_s0  ;;  %s1322_s19 = smov 0  }
   0x2   :  { %1502 = sst [smem:[#allocation9_spill]] %s1487_s1  ;;  %s1324_s20 = smov 0  }
   0x3   :  { %1503 = sst [smem:[#allocation10_spill]] %s1495_s9  ;;  %s1326_s21 = smov 0  }
   0x4   :  { %1504 = sst [smem:[#allocation11_spill]] %s1496_s10 }
   0x5 LB: > { %1505 = sst [smem:[#allocation3_spill]] %s1244_s19  ;;  %s33_s22 = sadd.s32 1, %s1244_s19  ;;  %s1252_s21 = sphi %s1326_s21, %s21_s21   ;;  %s1248_s20 = sphi %s1324_s20, %s1519_s20   ;;  %s1244_s19 = sphi %s1322_s19, %s1518_s19   ;;  %s1240_s18 = sphi %s1320_s18, %s1517_s18   ;;  %s1236_s17 = sphi %s1318_s17, %s1516_s17  }
   0x6   : > { %1506 = sst [smem:[#allocation4_spill]] %s1248_s20  ;;  %s40_s23 = sadd.s32 1, %s1248_s20 }
   0x7   : > { %1507 = sst [smem:[#allocation5_spill]] %s1252_s21  ;;  %p34_p0 = scmp.ge.s32.totalorder %s33_s22, 4 }
   0x8   : > { %p1084_p1 = scmp.ge.s32.totalorder %s1252_s21, 1  ;;  %p418_p2 = scmp.lt.s32.totalorder %s1252_s21, 9 }
   0x9   : > { %s1521_s22 = smov (%p34_p0, %s33_s22), 0  ;;  %s1523_s23 = smov (!%p34_p0, %s40_s23), %s1248_s20 }
   0xa   : > { %1508 = sst [smem:[#allocation6_spill]] %s1521_s22  ;;  %p419_p3 = pnand %p1084_p1, %p418_p2 }
   0xb   : > { %p42_p4 = scmp.ge.s32.totalorder %s1523_s23, 2  ;;  %p485_p5 = scmp.lt.s32.totalorder (!%p419_p3), %s1240_s18, 1 }
   0xc   : > { %422 = sbr.rel (%p419_p3) target bundleno = 1468 (0x5bc), region = 64  ;;  %p489_p6 = scmp.lt.s32.totalorder (!%p419_p3), %s1236_s17, 3 }
   0xd   : > { %s1525_s23 = smov (%p42_p4, %s1523_s23), 0  ;;  %s1510_s0 = sld [smem:[#allocation8_spill]] (!%p419_p3) }
   0xe   : > { %1509 = sst [smem:[#allocation7_spill]] %s1525_s23  ;;  %p1092_p7 = scmp.ne.s32.totalorder (!%p419_p3), %s1236_s17, 0 }
   0xf   : > { %s1511_s1 = sld [smem:[#allocation9_spill]] (!%p419_p3) }
  0x11   : > { %s1527_s18 = smov (!%p485_p5, %s1240_s18), 1 }
  0x12   : > { %s1352_s24 = scalar_select %p489_p6, %s1236_s17, 3 }
  0x13   : > { %s1085_s25 = sshll.u32 %s1527_s18, 3 }
  0x14   : > { %s488_s28 = scalar_lea.vmem %s1510_s0, %s1085_s25  ;;  %s1358_s29 = sshll.u32 %s1352_s24, 2 }
  0x15   : > { %s492_s13 = scalar_lea.vmem %s1511_s1, %s1358_s29  ;;  %s499_s18 = scalar_lea.vmem %s1489_s3, %s1358_s29 }
  0x16   : > { %s502_s27 = scalar_lea.vmem %s1490_s4, %s1352_s24  ;;  %s506_s21 = scalar_lea.vmem %s1491_s5, %s1358_s29 }
  0x17   : > { %s509_s1 = scalar_lea.vmem %s1492_s6, %s1352_s24  ;;  %s1110_s10 = sshll.u32 %s1352_s24, 4 }
  0x18   : > { %s1388_s15 = scalar_lea.vmem %s1497_s11, %s1085_s25  ;;  %s1393_s16 = scalar_lea.vmem %s1493_s7, %s1110_s10 }
  0x19   : > { %526 = sbr.rel (%p1092_p7) target bundleno = 32 (0x20), region = 68 }
  0x1e   : > { %vm527_vm0 = vcmask 261120   ;;  %v1254_v0 = vmov 0.0  }
  0x1f   : > { %528 = vst.msk [vmem:[#allocation2] sm:$0xff] %vm527_vm0, %v1254_v0 }
  0x20 PF: > { %vm544_vm1 = vcmask 261120   ;;  %v591_v1 = vld [vmem:[%s499_s18] sm:$0xf]  ;;  %v1255_v3 = vmov 0.0   ;;  %vm1256_vm2 = vmmov 0   ;;  %vm698_vm3 = vcmask 64512   ;;  %s1512_s20 = scalar_lea.vmem %s1488_s2, %s1352_s24 }
  0x21   : > { %v536_v2 = vld [vmem:[%s492_s13] sm:$0xf]  ;;  %1130 = vmatprep.subr.bf16.mxu1 %v1255_v3  ;;  %v603_v4 = vsel %vm544_vm1, %v591_v1, 0  ;;  %1124 = vmatprep.subr.bf16.mxu0 %v1255_v3  ;;  %v746_v25 = vlaneseq  ;;  %v1257_v29 = vmov -1e+30   ;;  %vm771_vm5 = vcmask 1043456  }
  0x22   : > { %v549_v5 = vsel %vm544_vm1, %v536_v2, 0  ;;  %v1400_v6 = vld [vmem:[%s488_s28] sm:$0xff]  ;;  %1131 = vmatpush3.bf16.xpose.msra.mxu1 %v603_v4  ;;  %1132 = vmatprep.mubr.msk.bf16.mxu1 %vm1256_vm2, %v1255_v3  ;;  %v1206_v50 = vld [vmem:[%s1393_s16 + $0x8] sm:$0xff]   ;;  %p1104_p8 = scmp.ne.s32.totalorder %s1236_s17, 3 }
  0x23   : > { %1125 = vmatpush3.bf16.xpose.msra.mxu0 %v549_v5  ;;  %1126 = vmatprep.mubr.msk.bf16.mxu0 %vm1256_vm2, %v1255_v3  ;;  %v533_v7 = vpack.c.bf16 %v1400_v6, %v1400_v6  ;;  %v1095_v8 = vld [vmem:[%s502_s27] ss:$0 sm:$0xff]  ;;  %v747_v26 = vshrl.u32 %v746_v25, 7  ;;  %v751_v27 = vand.u32 127, %v746_v25  ;;  %v837_v51 = vsel %vm698_vm3, %v1206_v50, 0  ;;  %s1514_s27 = sld [smem:[#allocation11_spill]] (!%p1104_p8) }
  0x24   : > { %1142 = vmatprep.subr.bf16.mxu1 %v1255_v3  ;;  %1136 = vmatprep.subr.bf16.mxu0 %v1255_v3  ;;  %v1093_v13 = vld [vmem:[%s1512_s20] ss:$0 sm:$0xff] }
  0x25   : > { %v645_v23 = vld [vmem:[%s506_s21] sm:$0xf]  ;;  %vm752_vm4 = vcmp.le.s32.totalorder %v751_v27, %v747_v26 }
  0x26   : > { %v654_v24 = vsel %vm544_vm1, %v645_v23, 0  ;;  %v753_v30 = vsel %vm752_vm4, 0.0, %v1257_v29  ;;  %v1097_v42 = vld [vmem:[%s509_s1] ss:$0 sm:$0xff] }
  0x27   : > { %v1207_v52 = vld [vmem:[%s1393_s16] sm:$0xff]   ;;  %s1513_s16 = sld [smem:[#allocation10_spill]] (!%p1104_p8) }
  0x28   : > { %v834_v53 = vsel %vm698_vm3, %v1207_v52, 0  ;;  %v535_v63 = vld [vmem:[#allocation2] sm:$0xff] }
  0x29   : > { %1133 = vmatmul.mubr.msk.bf16.vlgmr.msra.gmra.mxu1 %vm544_vm1, %v533_v7 }
  0x2a   : > { %1127 = vmatmul.mubr.msk.bf16.vlgmr.msra.gmra.mxu0 %vm544_vm1, %v533_v7  ;;  %1144 = vmatprep.mubr.msk.bf16.mxu1 %vm1256_vm2, %v1255_v3 }
  0x2b   : > { %1138 = vmatprep.mubr.msk.bf16.mxu0 %vm1256_vm2, %v1255_v3  ;;  %1137 = vmatpush3.bf16.xpose.msra.mxu0 %v654_v24 }
  0x2c   : > { %1148 = vmatprep.subr.bf16.mxu0 %v1255_v3 }
  0x32   : > { %1139 = vmatmul.mubr.msk.bf16.vlgmr.msra.gmra.mxu0 %vm544_vm1, %v533_v7 }
  0x33   : > { %1150 = vmatprep.mubr.msk.bf16.mxu0 %vm1256_vm2, %v1255_v3 }
  0xe9   : > { %v639_v9 = vpop.f32.mrf.mxu1 }
  0xea   : > { %v585_v10 = vpop.f32.mrf.mxu0  ;;  %v640_v11 = vadd.f32 %v1095_v8, %v639_v9 }
  0xeb   : > { %v1134_v12 = vpop.f32.mrf.mxu1  ;;  %v586_v19 = vadd.f32 %v1093_v13, %v585_v10 }
  0xec   : > { %v1128_v14 = vpop.f32.mrf.mxu0  ;;  %v697_v15 = vpack.c.bf16 %v640_v11, %v640_v11 }
  0xed   : > { %v642_v16 = vpop.f32.mrf.mxu1  ;;  %v696_v22 = vpack.c.bf16 %v586_v19, %v586_v19 }
  0xee   : > { %v588_v17 = vpop.f32.mrf.mxu0  ;;  %v703_v18 = vsel %vm698_vm3, %v697_v15, 0 }
  0xef   : > { %v1135_v20 = vpop.f32.mrf.mxu1  ;;  %1143 = vmatpush3.bf16.xpose.msra.mxu1 %v703_v18 }
  0xf0   : > { %v1129_v21 = vpop.f32.mrf.mxu0  ;;  %1154 = vmatprep.subr.bf16.mxu1 %v1255_v3 }
  0xf2   : > { %v690_v43 = vpop.f32.mrf.mxu0 }
  0xf3   : > { %v691_v44 = vadd.f32 %v1097_v42, %v690_v43 }
  0xf4   : > { %v1140_v45 = vpop.f32.mrf.mxu0 }
  0xf5   : > { %v767_v46 = vpack.c.bf16 %v691_v44, %v691_v44 }
  0xf6   : > { %1145 = vmatmul.mubr.msk.bf16.vlgmr.msra.gmra.mxu1 %vm698_vm3, %v696_v22  ;;  %v693_v47 = vpop.f32.mrf.mxu0 }
  0xf7   : > { %1158 = vmatprep.mubr.msk.bf16.mxu1 %vm1256_vm2, %v1255_v3  ;;  %v773_v48 = vsel %vm771_vm5, %v767_v46, 0  ;;  %1155 = vmatpush3.bf16.xpose.msra.mxu1 %v837_v51 }
  0xf8   : > { %v1141_v49 = vpop.f32.mrf.mxu0  ;;  %1149 = vmatpush3.bf16.msra.mxu0 %v773_v48  ;;  %1156 = vmatprep.subr.bf16.mxu1 %v1255_v3 }
  0xff   : > { %1157 = vmatpush3.bf16.xpose.msra.mxu1 %v834_v53 }
 0x1b6   : > { %v739_v28 = vpop.f32.mrf.mxu1 }
 0x1b7   : > { %v745_v31 = vmul.f32 0.35355338, %v739_v28 }
 0x1b8   : > { %v1146_v32 = vpop.f32.mrf.mxu1 }
 0x1b9   : > { %v754_v33 = vadd.f32 %v753_v30, %v745_v31 }
 0x1ba   : > { %v742_v34 = vpop.f32.mrf.mxu1 }
 0x1bb   : > { %v755_v35 = vsel %vm698_vm3, %v754_v33, -inf }
 0x1bc   : > { %756 = vmax.xlane.f32.xlu0 %v755_v35  ;;  %v1147_v36 = vpop.f32.mrf.mxu1 }
 0x245   : > { %v757_v37 = vpop.xlane.xlu0 %756 }
 0x246   : > { %v758_v38 = vsub.f32 %v754_v33, %v757_v37 }
 0x248   : > { %v759_v39 = vmul.f32 1.442695, %v758_v38 }
 0x24a   : > { %1208 = vpow2.f32 %v759_v39 }
 0x257   : > { %v1209_v40 = vpop.eup %1208 }
 0x258   : > { %v761_v41 = vsel %vm698_vm3, %v1209_v40, 0.0 }
 0x259   : > { %762 = vadd.xlane.f32.xlu0 %v761_v41 }
 0x2e2   : > { %v763_v54 = vpop.xlane.xlu0 %762 }
 0x2e3   : > { %1210 = vrcp.f32 %v763_v54 }
 0x2f0   : > { %v1211_v55 = vpop.eup %1210 }
 0x2f1   : > { %v765_v56 = vmul.f32 %v1211_v55, %v1209_v40 }
 0x2f3   : > { %v766_v57 = vpack.c.bf16 %v765_v56, %v765_v56 }
 0x2f5   : > { %1151 = vmatmul.mubr.msk.bf16.vlgmr.msra.gmra.mxu0 %vm698_vm3, %v766_v57 }
 0x3b5   : > { %v809_v58 = vpop.f32.mrf.mxu0 }
 0x3b6   : > { %v815_v59 = vpack.c.bf16 %v809_v58, %v809_v58 }
 0x3b7   : > { %v1152_v60 = vpop.f32.mrf.mxu0 }
 0x3b8   : > { %1159 = vmatmul.mubr.msk.bf16.vlgmr.msra.gmra.mxu1 %vm698_vm3, %v815_v59 }
 0x3b9   : > { %v812_v61 = vpop.f32.mrf.mxu0 }
 0x3bb   : > { %v1153_v62 = vpop.f32.mrf.mxu0 }
 0x478   : > { %v873_v0 = vpop.f32.mrf.mxu1 }
 0x479   : > { %v879_v1 = vadd.f32 %v873_v0, %v535_v63 }
 0x47a   : > { %v1160_v2 = vpop.f32.mrf.mxu1  ;;  %884 = sbr.rel (%p1104_p8) target bundleno = 1468 (0x5bc), region = 72 }
 0x47b   : > { %880 = vst.msk [vmem:[#allocation2] sm:$0xff] %vm544_vm1, %v879_v1 }
 0x47c   : > { %v876_v3 = vpop.f32.mrf.mxu1 }
 0x47e   : > { %v1161_v4 = vpop.f32.mrf.mxu1 }
 0x47f   : > { %v1105_v7 = vld [vmem:[%s1494_s8] ss:$0 sm:$0xff] }
 0x480   : > { %v1107_v21 = vld [vmem:[%s1514_s27] ss:$0 sm:$0xff] }
 0x482   : > { %v885_v5 = vld [vmem:[#allocation2] sm:$0xff] }
 0x483   : > { %v886_v8 = vadd.f32 %v885_v5, %v1400_v6  ;;  %v1106_v6 = vld [vmem:[%s1513_s16] ss:$0 sm:$0xff] }
 0x485   : > { %v894_v9 = vadd.f32 %v1105_v7, %v886_v8 }
 0x487   : > { %v897_v10 = vsel %vm544_vm1, %v894_v9, 0.0 }
 0x488   : > { %898 = vadd.xlane.f32.xlu0 %v897_v10 }
 0x511   : > { %v899_v11 = vpop.xlane.xlu0 %898 }
 0x512   : > { %v901_v12 = vmul.f32 0.03125, %v899_v11 }
 0x514   : > { %v902_v13 = vsub.f32 %v894_v9, %v901_v12 }
 0x516   : > { %v903_v14 = vmul.f32 %v902_v13, %v902_v13 }
 0x518   : > { %v904_v15 = vsel %vm544_vm1, %v903_v14, 0.0 }
 0x519   : > { %905 = vadd.xlane.f32.xlu0 %v904_v15 }
 0x5a2   : > { %v906_v16 = vpop.xlane.xlu0 %905 }
 0x5a3   : > { %v907_v17 = vmul.f32 0.03125, %v906_v16 }
 0x5a5   : > { %v908_v18 = vadd.f32 1e-05, %v907_v17 }
 0x5a7   : > { %1212 = vrsqrt.f32 %v908_v18 }
 0x5b4   : > { %v1213_v19 = vpop.eup %1212 }
 0x5b5   : > { %v910_v20 = vmul.f32 %v1213_v19, %v902_v13 }
 0x5b7   : > { %v917_v22 = vmul.f32 %v1106_v6, %v910_v20 }
 0x5b9   : > { %v924_v23 = vadd.f32 %v1107_v21, %v917_v22 }
 0x5bb   : > { %925 = vst.msk [vmem:[%s1388_s15] sm:$0xff] %vm544_vm1, %v924_v23 }
 0x5bc PF: > { %s1515_s30 = sld [smem:[#allocation5_spill]] }
 0x5bd   : > { %s1516_s17 = sld [smem:[#allocation3_spill]] }
 0x5be   : > { %s1517_s18 = sld [smem:[#allocation4_spill]] }
 0x5bf   : > { %s1518_s19 = sld [smem:[#allocation6_spill]] }
 0x5c0   : > { %s1519_s20 = sld [smem:[#allocation7_spill]] }
 0x5c2   : > { %s21_s21 = sadd.s32 1, %s1515_s30  }
 0x5c3   : > { %p18_p9 = scmp.ge.s32.totalorder %s21_s21, 10  }
 0x5c5   :  { %20 = sbr.rel (!%p18_p9) target bundleno = 5 (0x5), region = 124 }

// kernel: transformer_decoder_forward.6
= control target key start
LH: loop header
LB: loop body
LE: loop exit
PB: predicated region body
PF: predicated region fallthrough
CT: control target
= control target key end

     0   :  { %s1826_s27 = smov 0   ;;  %s1828_s28 = smov 0   ;;  %s2040_s0 = inlined_call_operand.vmem [shape: f32[2,8,32], index: 0, kind: input, shape index: {}]   ;;  %s2041_s1 = inlined_call_operand.vmem [shape: f32[2,12,32], index: 1, kind: input, shape index: {}]   ;;  %s2042_s2 = inlined_call_operand.vmem [shape: bf16[4,8,32], index: 2, kind: input, shape index: {}]   ;;  %s2043_s3 = inlined_call_operand.vmem [shape: f32[4,1,8], index: 3, kind: input, shape index: {}]   ;;  %s2044_s4 = inlined_call_operand.vmem [shape: bf16[4,8,32], index: 4, kind: input, shape index: {}]   ;;  %s2045_s5 = inlined_call_operand.vmem [shape: f32[4,1,8], index: 5, kind: input, shape index: {}]   ;;  %s2046_s6 = inlined_call_operand.vmem [shape: bf16[4,8,32], index: 6, kind: input, shape index: {}]   ;;  %s2047_s7 = inlined_call_operand.vmem [shape: f32[4,1,8], index: 7, kind: input, shape index: {}]   ;;  %s2048_s8 = inlined_call_operand.vmem [shape: bf16[4,32,8], index: 8, kind: input, shape index: {}]   ;;  %s2049_s9 = inlined_call_operand.vmem [shape: f32[1,32], index: 9, kind: input, shape index: {}]   ;;  %s2050_s10 = inlined_call_operand.vmem [shape: f32[1,32], index: 10, kind: input, shape index: {}]   ;;  %s2051_s11 = inlined_call_operand.vmem [shape: f32[1,32], index: 11, kind: input, shape index: {}]   ;;  %s2052_s12 = inlined_call_operand.vmem [shape: bf16[64,32], index: 12, kind: input, shape index: {}]   ;;  %s2053_s13 = inlined_call_operand.vmem [shape: f32[1,64], index: 13, kind: input, shape index: {}]   ;;  %s2054_s14 = inlined_call_operand.vmem [shape: bf16[32,64], index: 14, kind: input, shape index: {}]   ;;  %s2055_s15 = inlined_call_operand.vmem [shape: f32[1,32], index: 15, kind: input, shape index: {}]   ;;  %s2056_s16 = inlined_call_operand.vmem [shape: f32[1,32], index: 16, kind: input, shape index: {}]   ;;  %s2057_s17 = inlined_call_operand.vmem [shape: f32[1,32], index: 17, kind: input, shape index: {}]   ;;  %s2058_s18 = inlined_call_operand.vmem [shape: f32[2,8,32], index: 18, kind: output, shape index: {}]  }
   0x1   :  { %2064 = sst [smem:[#allocation8_spill]] %s2040_s0  ;;  %s1830_s29 = smov 0  }
   0x2   :  { %2065 = sst [smem:[#allocation9_spill]] %s2041_s1  ;;  %s1832_s30 = smov 0  }
   0x3   :  { %2066 = sst [smem:[#allocation10_spill]] %s2042_s2  ;;  %s1834_s0 = smov 0  }
   0x4   :  { %2067 = sst [smem:[#allocation11_spill]] %s2049_s9 }
   0x5   :  { %2068 = sst [smem:[#allocation12_spill]] %s2050_s10 }
   0x6   :  { %2069 = sst [smem:[#allocation13_spill]] %s2051_s11 }
   0x7   :  { %2070 = sst [smem:[#allocation14_spill]] %s2052_s12 }
   0x8   :  { %2071 = sst [smem:[#allocation15_spill]] %s2053_s13 }
   0x9   :  { %2072 = sst [smem:[#allocation16_spill]] %s2054_s14 }
   0xa   :  { %2073 = sst [smem:[#allocation17_spill]] %s2055_s15 }
   0xb   :  { %2074 = sst [smem:[#allocation18_spill]] %s2056_s16 }
   0xc   :  { %2075 = sst [smem:[#allocation19_spill]] %s2057_s17 }
   0xd LB: > { %2076 = sst [smem:[#allocation3_spill]] %s1716_s29  ;;  %s40_s19 = sadd.s32 1, %s1716_s29  ;;  %s1724_s0 = sphi %s1834_s0, %s28_s0   ;;  %s1720_s30 = sphi %s1832_s30, %s2098_s30   ;;  %s1716_s29 = sphi %s1830_s29, %s2097_s29   ;;  %s1712_s28 = sphi %s1828_s28, %s2096_s28   ;;  %s1708_s27 = sphi %s1826_s27, %s2095_s27  }
   0xe   : > { %2077 = sst [smem:[#allocation4_spill]] %s1720_s30  ;;  %s47_s1 = sadd.s32 1, %s1720_s30 }
   0xf   : > { %2078 = sst [smem:[#allocation5_spill]] %s1724_s0  ;;  %p41_p0 = scmp.ge.s32.totalorder %s40_s19, 4 }
  0x10   : > { %p1504_p1 = scmp.ge.s32.totalorder %s1724_s0, 1  ;;  %p608_p2 = scmp.lt.s32.totalorder %s1724_s0, 9 }
  0x11   : > { %s2100_s19 = smov (%p41_p0, %s40_s19), 0  ;;  %s2102_s1 = smov (!%p41_p0, %s47_s1), %s1720_s30 }
  0x12   : > { %2079 = sst [smem:[#allocation6_spill]] %s2100_s19  ;;  %p609_p3 = pnand %p1504_p1, %p608_p2 }
  0x13   : > { %p49_p4 = scmp.ge.s32.totalorder %s2102_s1, 2  ;;  %p697_p5 = scmp.lt.s32.totalorder (!%p609_p3), %s1712_s28, 1 }
  0x14   : > { %612 = sbr.rel (%p609_p3) target bundleno = 2184 (0x888), region = 92  ;;  %p709_p6 = scmp.lt.s32.totalorder (!%p609_p3), %s1708_s27, 3 }
  0x15   : > { %s2104_s1 = smov (%p49_p4, %s2102_s1), 0  ;;  %s2081_s24 = sld [smem:[#allocation8_spill]] (!%p609_p3) }
  0x16   : > { %2080 = sst [smem:[#allocation7_spill]] %s2104_s1  ;;  %p1514_p7 = scmp.ne.s32.totalorder (!%p609_p3), %s1708_s27, 0 }
  0x17   : > { %s2082_s19 = sld [smem:[#allocation9_spill]] (!%p609_p3) }
  0x18   : > { %s2083_s13 = sld [smem:[#allocation10_spill]] (!%p609_p3) }
  0x19   : > { %s2106_s28 = smov (!%p697_p5, %s1712_s28), 1 }
  0x1a   : > { %s1860_s20 = scalar_select %p709_p6, %s1708_s27, 3 }
  0x1b   : > { %s1505_s21 = sshll.u32 %s2106_s28, 3  ;;  %s1544_s22 = sshll.u32 %s2106_s28, 4 }
  0x1c   : > { %s1865_s25 = scalar_lea.vmem %s2081_s24, %s1505_s21  ;;  %s1871_s29 = sshll.u32 %s1860_s20, 2 }
  0x1d   : > { %s708_s30 = scalar_lea.vmem %s2082_s19, %s1544_s22  ;;  %s719_s24 = scalar_lea.vmem %s2044_s4, %s1871_s29 }
  0x1e   : > { %s712_s11 = scalar_lea.vmem %s2083_s13, %s1871_s29  ;;  %s722_s19 = scalar_lea.vmem %s2045_s5, %s1860_s20 }
  0x1f   : > { %s726_s17 = scalar_lea.vmem %s2046_s6, %s1871_s29  ;;  %s729_s16 = scalar_lea.vmem %s2047_s7, %s1860_s20 }
  0x20   : > { %s1545_s12 = sshll.u32 %s1860_s20, 4  ;;  %s1906_s23 = scalar_lea.vmem %s2058_s18, %s1505_s21 }
  0x21   : > { %s1901_s13 = scalar_lea.vmem %s2048_s8, %s1545_s12  ;;  %746 = sbr.rel (%p1514_p7) target bundleno = 40 (0x28), region = 96 }
  0x26   : > { %vm747_vm0 = vcmask 261120   ;;  %v1726_v0 = vmov 0.0  }
  0x27   : > { %748 = vst.msk [vmem:[#allocation2] sm:$0xff] %vm747_vm0, %v1726_v0 }
  0x28 PF: > { %vm763_vm1 = vcmask 261120   ;;  %v810_v1 = vld [vmem:[%s719_s24] sm:$0xf]  ;;  %v1727_v2 = vmov 0.0   ;;  %vm1728_vm2 = vmmov 0   ;;  %s2084_s14 = scalar_lea.vmem %s2043_s3, %s1860_s20  ;;  %vm919_vm3 = vcmask 64512  }
  0x29   : > { %1573 = vmatprep.subr.bf16.mxu1 %v1727_v2  ;;  %v822_v3 = vsel %vm763_vm1, %v810_v1, 0  ;;  %1567 = vmatprep.subr.bf16.mxu0 %v1727_v2  ;;  %v755_v4 = vld [vmem:[%s712_s11] sm:$0xf]  ;;  %v752_v7 = vld [vmem:[%s708_s30 + $0x8] sm:$0xf]  ;;  %vm967_vm4 = vcmask 97280  }
  0x2a   : > { %v751_v5 = vld [vmem:[%s708_s30] sm:$0xff]  ;;  %1574 = vmatpush3.bf16.xpose.msra.mxu1 %v822_v3  ;;  %1575 = vmatprep.mubr.msk.bf16.mxu1 %vm1728_vm2, %v1727_v2  ;;  %v768_v6 = vsel %vm763_vm1, %v755_v4, 0  ;;  %vm984_vm5 = vcmask 1045504   ;;  %v1670_v49 = vld [vmem:[%s1901_s13 + $0x8] sm:$0xff]   ;;  %p1526_p8 = scmp.ne.s32.totalorder %s1708_s27, 3 }
  0x2b   : > { %v1916_v8 = vld [vmem:[%s1865_s25] sm:$0xff]  ;;  %1568 = vmatpush3.bf16.xpose.msra.mxu0 %v768_v6  ;;  %1569 = vmatprep.mubr.msk.bf16.mxu0 %vm1728_vm2, %v1727_v2  ;;  %v753_v9 = vpack.c.bf16 %v752_v7, %v751_v5  ;;  %v1050_v50 = vsel %vm919_vm3, %v1670_v49, 0  ;;  %s2085_s24 = sld [smem:[#allocation11_spill]] (!%p1526_p8) }
  0x2c   : > { %1585 = vmatprep.subr.bf16.mxu1 %v1727_v2  ;;  %1579 = vmatprep.subr.bf16.mxu0 %v1727_v2  ;;  %v750_v10 = vpack.c.bf16 %v1916_v8, %v1916_v8  ;;  %v1517_v13 = vld [vmem:[%s722_s19] ss:$0 sm:$0xff]  ;;  %s2086_s22 = sld [smem:[#allocation14_spill]] (!%p1526_p8) }
  0x2d   : > { %v1515_v21 = vld [vmem:[%s2084_s14] ss:$0 sm:$0xff]  ;;  %s2087_s9 = sld [smem:[#allocation16_spill]] (!%p1526_p8) }
  0x2e   : > { %v865_v27 = vld [vmem:[%s726_s17] sm:$0xf]  ;;  %s2088_s12 = sld [smem:[#allocation12_spill]] (!%p1526_p8) }
  0x2f   : > { %v874_v28 = vsel %vm763_vm1, %v865_v27, 0  ;;  %v1519_v42 = vld [vmem:[%s729_s16] ss:$0 sm:$0xff]  ;;  %s2089_s21 = sld [smem:[#allocation13_spill]] (!%p1526_p8) }
  0x30   : > { %v1671_v51 = vld [vmem:[%s1901_s13] sm:$0xff]   ;;  %s2091_s27 = sld [smem:[#allocation17_spill]] (!%p1526_p8) }
  0x31   : > { %1576 = vmatmul.mubr.msk.bf16.vlgmr.msra.gmra.mxu1 %vm763_vm1, %v753_v9  ;;  %v1047_v52 = vsel %vm919_vm3, %v1671_v51, 0  ;;  %v754_v62 = vld [vmem:[#allocation2] sm:$0xff]  ;;  %s2092_s0 = sld [smem:[#allocation18_spill]] (!%p1526_p8) }
  0x32   : > { %1570 = vmatmul.mubr.msk.bf16.vlgmr.msra.gmra.mxu0 %vm763_vm1, %v750_v10  ;;  %1587 = vmatprep.mubr.msk.bf16.mxu1 %vm1728_vm2, %v1727_v2  ;;  %s2093_s28 = sld [smem:[#allocation19_spill]] (!%p1526_p8) }
  0x33   : > { %1581 = vmatprep.mubr.msk.bf16.mxu0 %vm1728_vm2, %v1727_v2  ;;  %1580 = vmatpush3.bf16.xpose.msra.mxu0 %v874_v28 }
  0x34   : > { %1591 = vmatprep.subr.bf16.mxu0 %v1727_v2 }
  0x3a   : > { %1582 = vmatmul.mubr.msk.bf16.vlgmr.msra.gmra.mxu0 %vm763_vm1, %v753_v9 }
  0x3b   : > { %1593 = vmatprep.mubr.msk.bf16.mxu0 %vm1728_vm2, %v1727_v2 }
  0xf1   : > { %v858_v11 = vpop.f32.mrf.mxu1 }
  0xf2   : > { %v804_v12 = vpop.f32.mrf.mxu0  ;;  %v859_v17 = vadd.f32 %v1517_v13, %v858_v11 }
  0xf3   : > { %v1577_v14 = vpop.f32.mrf.mxu1  ;;  %v805_v24 = vadd.f32 %v1515_v21, %v804_v12 }
  0xf4   : > { %v1571_v15 = vpop.f32.mrf.mxu0 }
  0xf5   : > { %v861_v16 = vpop.f32.mrf.mxu1  ;;  %v917_v26 = vpack.c.bf16 %v805_v24, %v805_v24 }
  0xf6   : > { %v862_v18 = vadd.f32 %v1517_v13, %v861_v16  ;;  %v807_v19 = vpop.f32.mrf.mxu0 }
  0xf7   : > { %v1578_v20 = vpop.f32.mrf.mxu1 }
  0xf8   : > { %v918_v22 = vpack.c.bf16 %v862_v18, %v859_v17  ;;  %v1572_v23 = vpop.f32.mrf.mxu0 }
  0xfa   : > { %v924_v25 = vsel %vm919_vm3, %v918_v22, 0  ;;  %v910_v35 = vpop.f32.mrf.mxu0 }
  0xfb   : > { %1586 = vmatpush3.bf16.xpose.msra.mxu1 %v924_v25  ;;  %v911_v43 = vadd.f32 %v1519_v42, %v910_v35 }
  0xfc   : > { %1597 = vmatprep.subr.bf16.mxu1 %v1727_v2  ;;  %v1583_v36 = vpop.f32.mrf.mxu0 }
  0xfe   : > { %v913_v44 = vpop.f32.mrf.mxu0 }
  0xff   : > { %v914_v45 = vadd.f32 %v1519_v42, %v913_v44 }
 0x100   : > { %v1584_v46 = vpop.f32.mrf.mxu0 }
 0x101   : > { %v980_v47 = vpack.c.bf16 %v914_v45, %v911_v43 }
 0x102   : > { %1588 = vmatmul.mubr.msk.bf16.vlgmr.msra.gmra.mxu1 %vm919_vm3, %v917_v26 }
 0x103   : > { %1601 = vmatprep.mubr.msk.bf16.mxu1 %vm1728_vm2, %v1727_v2  ;;  %v986_v48 = vsel %vm984_vm5, %v980_v47, 0  ;;  %1598 = vmatpush3.bf16.xpose.msra.mxu1 %v1050_v50 }
 0x104   : > { %1592 = vmatpush3.bf16.msra.mxu0 %v986_v48  ;;  %1599 = vmatprep.subr.bf16.mxu1 %v1727_v2 }
 0x10b   : > { %1600 = vmatpush3.bf16.xpose.msra.mxu1 %v1047_v52 }
 0x1c2   : > { %v960_v29 = vpop.f32.mrf.mxu1 }
 0x1c3   : > { %v966_v30 = vmul.f32 0.35355338, %v960_v29 }
 0x1c4   : > { %v1589_v31 = vpop.f32.mrf.mxu1 }
 0x1c5   : > { %v968_v32 = vsel %vm967_vm4, %v966_v30, -inf }
 0x1c6   : > { %969 = vmax.xlane.f32.xlu0 %v968_v32  ;;  %v963_v33 = vpop.f32.mrf.mxu1 }
 0x1c8   : > { %v1590_v34 = vpop.f32.mrf.mxu1 }
 0x24f   : > { %v970_v37 = vpop.xlane.xlu0 %969 }
 0x250   : > { %v971_v38 = vsub.f32 %v966_v30, %v970_v37 }
 0x252   : > { %v972_v39 = vmul.f32 1.442695, %v971_v38 }
 0x254   : > { %1672 = vpow2.f32 %v972_v39 }
 0x261   : > { %v1673_v40 = vpop.eup %1672 }
 0x262   : > { %v974_v41 = vsel %vm967_vm4, %v1673_v40, 0.0 }
 0x263   : > { %975 = vadd.xlane.f32.xlu0 %v974_v41 }
 0x2ec   : > { %v976_v53 = vpop.xlane.xlu0 %975 }
 0x2ed   : > { %1674 = vrcp.f32 %v976_v53 }
 0x2fa   : > { %v1675_v54 = vpop.eup %1674 }
 0x2fb   : > { %v978_v55 = vmul.f32 %v1675_v54, %v1673_v40 }
 0x2fd   : > { %v979_v56 = vpack.c.bf16 %v978_v55, %v978_v55 }
 0x2ff   : > { %1594 = vmatmul.mubr.msk.bf16.vlgmr.msra.gmra.mxu0 %vm967_vm4, %v979_v56 }
 0x3bf   : > { %v1022_v57 = vpop.f32.mrf.mxu0 }
 0x3c0   : > { %v1028_v58 = vpack.c.bf16 %v1022_v57, %v1022_v57 }
 0x3c1   : > { %v1595_v59 = vpop.f32.mrf.mxu0 }
 0x3c2   : > { %1602 = vmatmul.mubr.msk.bf16.vlgmr.msra.gmra.mxu1 %vm919_vm3, %v1028_v58 }
 0x3c3   : > { %v1025_v60 = vpop.f32.mrf.mxu0 }
 0x3c5   : > { %v1596_v61 = vpop.f32.mrf.mxu0 }
 0x482   : > { %v1086_v63 = vpop.f32.mrf.mxu1 }
 0x483   : > { %v1092_v0 = vadd.f32 %v1086_v63, %v754_v62 }
 0x484   : > { %v1603_v1 = vpop.f32.mrf.mxu1  ;;  %1097 = sbr.rel (%p1526_p8) target bundleno = 2184 (0x888), region = 100 }
 0x485   : > { %1093 = vst.msk [vmem:[#allocation2] sm:$0xff] %vm763_vm1, %v1092_v0 }
 0x486   : > { %v1089_v2 = vpop.f32.mrf.mxu1 }
 0x488   : > { %v1604_v3 = vpop.f32.mrf.mxu1 }
 0x489   : > { %v1527_v5 = vld [vmem:[%s2085_s24] ss:$0 sm:$0xff]  ;;  %v1676_v10 = vld [vmem:[%s2086_s22 + $0x18] sm:$0xff]   ;;  %v1729_v11 = vmov 0.0   ;;  %v1677_v17 = vld [vmem:[%s2086_s22 + $0x10] sm:$0xff]   ;;  %vm1730_vm6 = vmmov 0  }
 0x48a   : > { %1605 = vmatprep.subr.bf16.mxu0 %v1729_v11  ;;  %1617 = vmatprep.subr.bf16.mxu1 %v1729_v11  ;;  %v1187_v12 = vsel %vm763_vm1, %v1676_v10, 0  ;;  %v1184_v18 = vsel %vm763_vm1, %v1677_v17, 0  ;;  %v1678_v19 = vld [vmem:[%s2086_s22 + $0x8] sm:$0xff]   ;;  %v1679_v21 = vld [vmem:[%s2086_s22] sm:$0xff]   ;;  %vm1252_vm7 = vcmask 523264   ;;  %s2090_s24 = sld [smem:[#allocation15_spill]] }
 0x48b   : > { %1606 = vmatpush3.bf16.xpose.msra.mxu0 %v1187_v12  ;;  %1613 = vmatprep.mubr.msk.bf16.mxu0 %vm1730_vm6, %v1729_v11  ;;  %v1181_v20 = vsel %vm763_vm1, %v1678_v19, 0  ;;  %v1178_v22 = vsel %vm763_vm1, %v1679_v21, 0  ;;  %v1680_v23 = vld [vmem:[%s2087_s9 + $0x8] sm:$0xff]   ;;  %v1528_v29 = vld [vmem:[%s2088_s12] ss:$0 sm:$0xff] }
 0x48c   : > { %v1098_v4 = vld [vmem:[#allocation2] sm:$0xff]  ;;  %1607 = vmatprep.subr.bf16.mxu0 %v1729_v11  ;;  %1621 = vmatprep.mubr.msk.bf16.mxu1 %vm1730_vm6, %v1729_v11  ;;  %v1260_v24 = vsel %vm1252_vm7, %v1680_v23, 0 }
 0x48d   : > { %v1099_v6 = vadd.f32 %v1098_v4, %v1916_v8  ;;  %1618 = vmatpush3.bf16.xpose.msra.mxu1 %v1260_v24  ;;  %v1529_v31 = vld [vmem:[%s2089_s21] ss:$0 sm:$0xff] }
 0x48e   : > { %1619 = vmatprep.subr.bf16.mxu1 %v1729_v11  ;;  %v1681_v35 = vld [vmem:[%s2087_s9] sm:$0xff]  }
 0x48f   : > { %v1107_v7 = vadd.f32 %v1527_v5, %v1099_v6  ;;  %v1257_v36 = vsel %vm1252_vm7, %v1681_v35, 0  ;;  %v1536_v45 = vld [vmem:[%s2091_s27] ss:$0 sm:$0xff] }
 0x490   : > { %v1530_v37 = vld [vmem:[%s2090_s24] ss:$0 sm:$0xff] }
 0x491   : > { %v1110_v9 = vsel %vm763_vm1, %v1107_v7, 0.0  ;;  %v1540_v62 = vld [vmem:[%s2092_s0] ss:$0 sm:$0xff] }
 0x492   : > { %1111 = vadd.xlane.f32.xlu0 %v1110_v9  ;;  %v1541_v0 = vld [vmem:[%s2093_s28] ss:$0 sm:$0xff] }
 0x493   : > { %1608 = vmatpush3.bf16.xpose.msra.mxu0 %v1184_v18 }
 0x494   : > { %1609 = vmatprep.subr.bf16.mxu0 %v1729_v11 }
 0x495   : > { %1620 = vmatpush3.bf16.xpose.msra.mxu1 %v1257_v36 }
 0x49b   : > { %1610 = vmatpush3.bf16.xpose.msra.mxu0 %v1181_v20 }
 0x49c   : > { %1611 = vmatprep.subr.bf16.mxu0 %v1729_v11 }
 0x4a3   : > { %1612 = vmatpush3.bf16.xpose.msra.mxu0 %v1178_v22 }
 0x51b   : > { %v1112_v13 = vpop.xlane.xlu0 %1111 }
 0x51c   : > { %v1114_v14 = vmul.f32 0.03125, %v1112_v13 }
 0x51e   : > { %v1115_v15 = vsub.f32 %v1107_v7, %v1114_v14 }
 0x520   : > { %v1116_v16 = vmul.f32 %v1115_v15, %v1115_v15 }
 0x522   : > { %v1117_v8 = vsel %vm763_vm1, %v1116_v16, 0.0 }
 0x523   : > { %1118 = vadd.xlane.f32.xlu0 %v1117_v8 }
 0x5ac   : > { %v1119_v25 = vpop.xlane.xlu0 %1118 }
 0x5ad   : > { %v1120_v26 = vmul.f32 0.03125, %v1119_v25 }
 0x5af   : > { %v1121_v27 = vadd.f32 1e-05, %v1120_v26 }
 0x5b1   : > { %1682 = vrsqrt.f32 %v1121_v27 }
 0x5be   : > { %v1683_v28 = vpop.eup %1682 }
 0x5bf   : > { %v1123_v30 = vmul.f32 %v1683_v28, %v1115_v15 }
 0x5c1   : > { %v1130_v32 = vmul.f32 %v1528_v29, %v1123_v30 }
 0x5c3   : > { %v1137_v33 = vadd.f32 %v1529_v31, %v1130_v32 }
 0x5c5   : > { %v1138_v34 = vpack.c.bf16 %v1137_v33, %v1137_v33 }
 0x5c7   : > { %1614 = vmatmul.mubr.msk.bf16.vlgmr.msra.gmra.mxu0 %vm763_vm1, %v1138_v34 }
 0x687   : > { %v1223_v38 = vpop.f32.mrf.mxu0 }
 0x688   : > { %v1224_v39 = vadd.f32 %v1530_v37, %v1223_v38 }
 0x689   : > { %v1615_v40 = vpop.f32.mrf.mxu0 }
 0x68a   : > { %v1229_v41 = vmax.f32 %v1224_v39, 0.0 }
 0x68b   : > { %v1226_v42 = vpop.f32.mrf.mxu0 }
 0x68c   : > { %v1230_v43 = vpack.c.bf16 %v1229_v41, %v1229_v41 }
 0x68d   : > { %v1616_v44 = vpop.f32.mrf.mxu0 }
 0x68e   : > { %1622 = vmatmul.mubr.msk.bf16.vlgmr.msra.gmra.mxu1 %vm1252_vm7, %v1230_v43 }
 0x74e   : > { %v1296_v46 = vpop.f32.mrf.mxu1 }
 0x74f   : > { %v1297_v47 = vadd.f32 %v1536_v45, %v1296_v46 }
 0x750   : > { %v1623_v48 = vpop.f32.mrf.mxu1 }
 0x751   : > { %v1302_v49 = vadd.f32 %v1297_v47, %v1137_v33 }
 0x752   : > { %v1299_v50 = vpop.f32.mrf.mxu1 }
 0x753   : > { %v1305_v51 = vsel %vm763_vm1, %v1302_v49, 0.0 }
 0x754   : > { %1306 = vadd.xlane.f32.xlu1 %v1305_v51  ;;  %v1624_v52 = vpop.f32.mrf.mxu1 }
 0x7dd   : > { %v1307_v53 = vpop.xlane.xlu1 %1306 }
 0x7de   : > { %v1308_v54 = vmul.f32 0.03125, %v1307_v53 }
 0x7e0   : > { %v1309_v55 = vsub.f32 %v1302_v49, %v1308_v54 }
 0x7e2   : > { %v1310_v56 = vmul.f32 %v1309_v55, %v1309_v55 }
 0x7e4   : > { %v1311_v57 = vsel %vm763_vm1, %v1310_v56, 0.0 }
 0x7e5   : > { %1312 = vadd.xlane.f32.xlu1 %v1311_v57 }
 0x86e   : > { %v1313_v58 = vpop.xlane.xlu1 %1312 }
 0x86f   : > { %v1314_v59 = vmul.f32 0.03125, %v1313_v58 }
 0x871   : > { %v1315_v60 = vadd.f32 1e-05, %v1314_v59 }
 0x873   : > { %1684 = vrsqrt.f32 %v1315_v60 }
 0x880   : > { %v1685_v61 = vpop.eup %1684 }
 0x881   : > { %v1317_v63 = vmul.f32 %v1685_v61, %v1309_v55 }
 0x883   : > { %v1324_v1 = vmul.f32 %v1540_v62, %v1317_v63 }
 0x885   : > { %v1331_v2 = vadd.f32 %v1541_v0, %v1324_v1 }
 0x887   : > { %1332 = vst.msk [vmem:[%s1906_s23] sm:$0xff] %vm763_vm1, %v1331_v2 }
 0x888 PF: > { %s2094_s2 = sld [smem:[#allocation5_spill]] }
 0x889   : > { %s2095_s27 = sld [smem:[#allocation3_spill]] }
 0x88a   : > { %s2096_s28 = sld [smem:[#allocation4_spill]] }
 0x88b   : > { %s2097_s29 = sld [smem:[#allocation6_spill]] }
 0x88c   : > { %s2098_s30 = sld [smem:[#allocation7_spill]] }
 0x88e   : > { %s28_s0 = sadd.s32 1, %s2094_s2  }
 0x88f   : > { %p25_p9 = scmp.ge.s32.totalorder %s28_s0, 10  }
 0x891   :  { %27 = sbr.rel (!%p25_p9) target bundleno = 13 (0xd), region = 154 }

</bundles_post_ra>
